<compile_context>
chip_gen: v6e
topology: v6e:2x2x1
jax: 0.10.0
libtpu: 0.0.40
codegen_flags: <defaults>
</compile_context>

<pallas_src>
from functools import partial

import jax
import jax.numpy as jnp
from jax.experimental import pallas as pl
from jax.experimental.pallas import tpu as pltpu


LANE = 128  # lane alignment for matmul N dims (H, O)


def _round_up(n: int, m: int) -> int:
    return ((n + m - 1) // m) * m


# --------------------------------------------------------------------------- #
# Kernel: one batch tile of  sigmoid(x @ W1 + b1) @ W2 + b2
# --------------------------------------------------------------------------- #
def mlp_kernel(x_ref, w1_ref, b1_ref, w2_ref, b2_ref, o_ref):
    # In-kernel f32 -> bf16 cast of the activation tile (VPU), MXU matmul with
    # f32 accumulation.  K = In (784) need not be a lane multiple.
    x_bf16 = x_ref[...].astype(jnp.bfloat16)
    z1 = jnp.dot(x_bf16, w1_ref[...], preferred_element_type=jnp.float32)
    z1 = z1 + b1_ref[...]                                  # f32 bias broadcast

    # Exact sigmoid via a single EUP transcendental: sigmoid(z)=0.5*tanh(z/2)+0.5
    h = 0.5 * jnp.tanh(0.5 * z1) + 0.5

    # Output layer: (tb, H_p)bf16 @ (H_p, O_p)bf16 -> f32 accumulate on MXU.
    z2 = jnp.dot(h.astype(jnp.bfloat16), w2_ref[...],
                 preferred_element_type=jnp.float32)
    o_ref[...] = (z2 + b2_ref[...]).astype(o_ref.dtype)    # lane-dense store


# --------------------------------------------------------------------------- #
# One-time parameter preparation (hoisted out of the per-call path).
# Weights are given in (in, out) layout, i.e. PyTorch Linear.weight transposed,
# so the kernel computes sigmoid(x @ W1 + b1) @ W2 + b2.
# --------------------------------------------------------------------------- #
def prepare_mlp_params(w1, b1, w2, b2):
    In, H = w1.shape
    O = w2.shape[1]
    H_p = _round_up(H, LANE)
    O_p = _round_up(O, LANE)

    w1p = jnp.zeros((In, H_p), jnp.bfloat16).at[:, :H].set(w1.astype(jnp.bfloat16))
    b1p = jnp.zeros((1, H_p), jnp.float32).at[0, :H].set(b1.astype(jnp.float32))
    w2p = jnp.zeros((H_p, O_p), jnp.bfloat16).at[:H, :O].set(w2.astype(jnp.bfloat16))
    b2p = jnp.zeros((1, O_p), jnp.float32).at[0, :O].set(b2.astype(jnp.float32))
    return w1p, b1p, w2p, b2p


# --------------------------------------------------------------------------- #
# Forward pass.  max_batch_tile caps the x block so that the double-buffered
# VMEM footprint (2*tb*In*4 for x + 2*tb*O_p*4 for out + weights) stays well
# inside the default scoped VMEM on v5e (16 MiB) / v6e / v7x (32 MiB).
# --------------------------------------------------------------------------- #
@partial(jax.jit, static_argnames=("out_features", "max_batch_tile"))
def mnist_mlp_forward(x, w1p, b1p, w2p, b2p, *, out_features, max_batch_tile=1024):
    B, In = x.shape
    In_w, H_p = w1p.shape
    O_p = w2p.shape[1]
    assert In == In_w, "x feature dim must match W1"

    # Batch tiling: single tile (grid=(1,)) for typical batches — no per-step
    # pipeline overhead on single-TC chips; split only when the tile would
    # pressure scoped VMEM.
    if B <= max_batch_tile:
        tb, B_p = B, B                     # full-dim block: no (8,128) constraint
        x_in = x
    else:
        tb = max_batch_tile                # multiple of 8 by construction
        B_p = _round_up(B, tb)
        x_in = x if B_p == B else jnp.zeros((B_p, In), x.dtype).at[:B].set(x)
    grid = (B_p // tb,)

    cost = pl.CostEstimate(
        flops=2 * B_p * (In * H_p + H_p * O_p),
        transcendentals=B_p * H_p,
        bytes_accessed=(B_p * In * 4                      # x (f32)
                        + (In * H_p + H_p * O_p) * 2      # weights (bf16)
                        + (H_p + O_p) * 4                 # biases (f32)
                        + B_p * O_p * 4),                 # output (f32)
    )

    y_padded = pl.pallas_call(
        mlp_kernel,
        out_shape=jax.ShapeDtypeStruct((B_p, O_p), jnp.float32),
        grid_spec=pltpu.PrefetchScalarGridSpec(
            num_scalar_prefetch=0,
            grid=grid,
            in_specs=[
                pl.BlockSpec((tb, In), lambda i: (i, 0)),     # raw f32 x tile
                pl.BlockSpec((In, H_p), lambda i: (0, 0)),    # W1 (resident)
                pl.BlockSpec((1, H_p), lambda i: (0, 0)),     # b1 (resident)
                pl.BlockSpec((H_p, O_p), lambda i: (0, 0)),   # W2 (resident)
                pl.BlockSpec((1, O_p), lambda i: (0, 0)),     # b2 (resident)
            ],
            out_specs=pl.BlockSpec((tb, O_p), lambda i: (i, 0)),
        ),
        compiler_params=pltpu.CompilerParams(
            dimension_semantics=("parallel",),
            vmem_limit_bytes=32 * 1024 * 1024,
        ),
        cost_estimate=cost,
    )(x_in, w1p, b1p, w2p, b2p)

    # Slice back to the logical shape; fused into the same jit as the kernel.
    return y_padded[:B, :out_features]


def reference_forward(x, w1, b1, w2, b2):
    h = jax.nn.sigmoid(x @ w1 + b1)
    return h @ w2 + b2


if __name__ == "__main__":
    # MnistMlp(inputnodes=784, hiddennodes=100, outputnodes=10)
    batch, inputnodes, hiddennodes, outputnodes = 256, 784, 100, 10

    key = jax.random.PRNGKey(0)
    kx, kw1, kb1, kw2, kb2 = jax.random.split(key, 5)

    x = jax.random.normal(kx, (batch, inputnodes), dtype=jnp.float32)

    # Parameters in (in, out) layout (transposed PyTorch Linear.weight).
    w1 = jax.random.normal(kw1, (inputnodes, hiddennodes), dtype=jnp.float32) * 0.05
    b1 = jax.random.normal(kb1, (hiddennodes,), dtype=jnp.float32) * 0.05
    w2 = jax.random.normal(kw2, (hiddennodes, outputnodes), dtype=jnp.float32) * 0.05
    b2 = jax.random.normal(kb2, (outputnodes,), dtype=jnp.float32) * 0.05

    # One-time weight prep (padding + bf16 cast) — not on the per-call path.
    w1p, b1p, w2p, b2p = prepare_mlp_params(w1, b1, w2, b2)

    y = mnist_mlp_forward(x, w1p, b1p, w2p, b2p, out_features=outputnodes)
    y = jax.block_until_ready(y)

    y_ref = reference_forward(x, w1, b1, w2, b2)
    assert y.shape == (batch, outputnodes)
    # bf16 MXU inputs with f32 accumulation -> loosened tolerance vs f32 ref.
    assert jnp.allclose(y, y_ref, atol=2e-2, rtol=2e-2), "mismatch vs reference"

    print("KERNEL_OK")
</pallas_src>

<mosaic_0001>
module attributes {stable_mosaic.version = 11 : i64} {
  func.func @mlp_kernel(%arg0: i32, %arg1: memref<256x784xf32, #tpu.memory_space<vmem>>, %arg2: memref<784x128xbf16, #tpu.memory_space<vmem>>, %arg3: memref<1x128xf32, #tpu.memory_space<vmem>>, %arg4: memref<128x128xbf16, #tpu.memory_space<vmem>>, %arg5: memref<1x128xf32, #tpu.memory_space<vmem>>, %arg6: memref<256x128xf32, #tpu.memory_space<vmem>>) attributes {dimension_semantics = [#tpu.dimension_semantics<parallel>], iteration_bounds = array<i64: 1>, scalar_prefetch = 0 : i64, scratch_operands = 0 : i64, tpu.core_type = #tpu.core_type<tc>, window_params = [{transform_indices = @transform_0, window_bounds = array<i64: 256, 784>}, {pipeline_mode = #tpu.pipeline_mode<synchronous>, transform_indices = @transform_1, window_bounds = array<i64: 784, 128>}, {pipeline_mode = #tpu.pipeline_mode<synchronous>, transform_indices = @transform_2, window_bounds = array<i64: 1, 128>}, {pipeline_mode = #tpu.pipeline_mode<synchronous>, transform_indices = @transform_3, window_bounds = array<i64: 128, 128>}, {pipeline_mode = #tpu.pipeline_mode<synchronous>, transform_indices = @transform_4, window_bounds = array<i64: 1, 128>}, {transform_indices = @transform_5, window_bounds = array<i64: 256, 128>}]} {
    %c0 = arith.constant 0 : index
    %c0_0 = arith.constant 0 : index
    %0 = vector.load %arg1[%c0, %c0_0] : memref<256x784xf32, #tpu.memory_space<vmem>>, vector<256x784xf32>
    %1 = arith.truncf %0 : vector<256x784xf32> to vector<256x784xbf16>
    %c0_1 = arith.constant 0 : index
    %c0_2 = arith.constant 0 : index
    %2 = vector.load %arg2[%c0_1, %c0_2] : memref<784x128xbf16, #tpu.memory_space<vmem>>, vector<784x128xbf16>
    %cst = arith.constant dense<0.000000e+00> : vector<256x128xf32>
    %3 = tpu.matmul %1, %2, %cst {dimension_numbers = #tpu.dot_dimension_numbers<[1], [0], [0], [1], [0, 0, 1, 1], [], []>} : vector<256x784xbf16>, vector<784x128xbf16>, vector<256x128xf32> -> vector<256x128xf32>
    %c0_3 = arith.constant 0 : index
    %c0_4 = arith.constant 0 : index
    %4 = vector.load %arg3[%c0_3, %c0_4] : memref<1x128xf32, #tpu.memory_space<vmem>>, vector<1x128xf32>
    %5 = vector.broadcast %4 : vector<1x128xf32> to vector<256x128xf32>
    %6 = arith.addf %3, %5 : vector<256x128xf32>
    %cst_5 = arith.constant 5.000000e-01 : f32
    %7 = vector.broadcast %cst_5 : f32 to vector<256x128xf32>
    %8 = arith.mulf %7, %6 : vector<256x128xf32>
    %9 = math.tanh %8 : vector<256x128xf32>
    %cst_6 = arith.constant 5.000000e-01 : f32
    %10 = vector.broadcast %cst_6 : f32 to vector<256x128xf32>
    %11 = arith.mulf %10, %9 : vector<256x128xf32>
    %cst_7 = arith.constant 5.000000e-01 : f32
    %12 = vector.broadcast %cst_7 : f32 to vector<256x128xf32>
    %13 = arith.addf %11, %12 : vector<256x128xf32>
    %14 = arith.truncf %13 : vector<256x128xf32> to vector<256x128xbf16>
    %c0_8 = arith.constant 0 : index
    %c0_9 = arith.constant 0 : index
    %15 = vector.load %arg4[%c0_8, %c0_9] : memref<128x128xbf16, #tpu.memory_space<vmem>>, vector<128x128xbf16>
    %cst_10 = arith.constant dense<0.000000e+00> : vector<256x128xf32>
    %16 = tpu.matmul %14, %15, %cst_10 {dimension_numbers = #tpu.dot_dimension_numbers<[1], [0], [0], [1], [0, 0, 1, 1], [], []>} : vector<256x128xbf16>, vector<128x128xbf16>, vector<256x128xf32> -> vector<256x128xf32>
    %c0_11 = arith.constant 0 : index
    %c0_12 = arith.constant 0 : index
    %17 = vector.load %arg5[%c0_11, %c0_12] : memref<1x128xf32, #tpu.memory_space<vmem>>, vector<1x128xf32>
    %18 = vector.broadcast %17 : vector<1x128xf32> to vector<256x128xf32>
    %19 = arith.addf %16, %18 : vector<256x128xf32>
    %c0_13 = arith.constant 0 : index
    %c0_14 = arith.constant 0 : index
    %20 = vector.load %arg6[%c0_13, %c0_14] : memref<256x128xf32, #tpu.memory_space<vmem>>, vector<256x128xf32>
    tpu.vector_store %arg6[%c0_13, %c0_14], %19 {strides = array<i32>} : memref<256x128xf32, #tpu.memory_space<vmem>>, vector<256x128xf32>,
    return
  }
  func.func @transform_0(%arg0: i32) -> (i32, i32) {
    %c0_i32 = arith.constant 0 : i32
    %c0_i32_0 = arith.constant 0 : i32
    return %arg0, %c0_i32 : i32, i32
  }
  func.func @transform_1(%arg0: i32) -> (i32, i32) {
    %c0_i32 = arith.constant 0 : i32
    %c0_i32_0 = arith.constant 0 : i32
    %c0_i32_1 = arith.constant 0 : i32
    return %c0_i32, %c0_i32_0 : i32, i32
  }
  func.func @transform_2(%arg0: i32) -> (i32, i32) {
    %c0_i32 = arith.constant 0 : i32
    %c0_i32_0 = arith.constant 0 : i32
    %c0_i32_1 = arith.constant 0 : i32
    return %c0_i32, %c0_i32_0 : i32, i32
  }
  func.func @transform_3(%arg0: i32) -> (i32, i32) {
    %c0_i32 = arith.constant 0 : i32
    %c0_i32_0 = arith.constant 0 : i32
    %c0_i32_1 = arith.constant 0 : i32
    return %c0_i32, %c0_i32_0 : i32, i32
  }
  func.func @transform_4(%arg0: i32) -> (i32, i32) {
    %c0_i32 = arith.constant 0 : i32
    %c0_i32_0 = arith.constant 0 : i32
    %c0_i32_1 = arith.constant 0 : i32
    return %c0_i32, %c0_i32_0 : i32, i32
  }
  func.func @transform_5(%arg0: i32) -> (i32, i32) {
    %c0_i32 = arith.constant 0 : i32
    %c0_i32_0 = arith.constant 0 : i32
    return %arg0, %c0_i32 : i32, i32
  }
}

</mosaic_0001>

<bundles_post_ra>
// kernel: mnist_mlp_forward.1
= control target key start
LH: loop header
LB: loop body
LE: loop exit
PB: predicated region body
PF: predicated region fallthrough
CT: control target
= control target key end

     0   :  { %vm756_vm0 = vcmask 130048   ;;  %s3671_s1 = inlined_call_operand.vmem [shape: bf16[784,128], index: 1, kind: input, shape index: {}]   ;;  %s3672_s0 = inlined_call_operand.vmem [shape: f32[256,784], index: 0, kind: input, shape index: {}]   ;;  %s3673_s2 = inlined_call_operand.vmem [shape: f32[1,128], index: 2, kind: input, shape index: {}]   ;;  %s3674_s3 = inlined_call_operand.vmem [shape: bf16[128,128], index: 3, kind: input, shape index: {}]   ;;  %s3675_s4 = inlined_call_operand.vmem [shape: f32[1,128], index: 4, kind: input, shape index: {}]   ;;  %s3676_s5 = inlined_call_operand.vmem [shape: f32[256,128], index: 5, kind: output, shape index: {}]  }
   0x1   :  { %v2395_v0 = vld [vmem:[%s3671_s1 + $0x78] sm:$0xff]   ;;  %v2399_v4 = vld [vmem:[%s3671_s1 + $0x70] sm:$0xff]   ;;  %v2403_v8 = vld [vmem:[%s3671_s1 + $0x68] sm:$0xff]  }
   0x2   :  { %v2396_v1 = vld [vmem:[%s3671_s1 + $0x38] sm:$0xff]   ;;  %1936 = vmatprep.subr.bf16.mxu0 %v2395_v0  ;;  %v2400_v5 = vld [vmem:[%s3671_s1 + $0x30] sm:$0xff]   ;;  %v2404_v9 = vld [vmem:[%s3671_s1 + $0x28] sm:$0xff]  }
   0x3   :  { %v2397_v2 = vld [vmem:[%s3671_s1 + $0xf8] sm:$0xff]   ;;  %1937 = vmatpush3.bf16.msra.mxu0 %v2396_v1  ;;  %v2401_v6 = vld [vmem:[%s3671_s1 + $0xf0] sm:$0xff]   ;;  %v2405_v10 = vld [vmem:[%s3671_s1 + $0xe8] sm:$0xff]  }
   0x4   :  { %v2398_v3 = vld [vmem:[%s3671_s1 + $0xb8] sm:$0xff]   ;;  %2048 = vmatprep.subr.bf16.mxu1 %v2397_v2  ;;  %1938 = vmatprep.subr.bf16.mxu0 %v2399_v4  ;;  %v2402_v7 = vld [vmem:[%s3671_s1 + $0xb0] sm:$0xff]   ;;  %v2406_v11 = vld [vmem:[%s3671_s1 + $0xa8] sm:$0xff]  }
   0x5   :  { %2049 = vmatpush3.bf16.msra.mxu1 %v2398_v3  ;;  %v2407_v12 = vld [vmem:[%s3671_s1 + $0x60] sm:$0xff]   ;;  %v2411_v16 = vld [vmem:[%s3671_s1 + $0x58] sm:$0xff]   ;;  %v2415_v20 = vld [vmem:[%s3671_s1 + $0x50] sm:$0xff]  }
   0x6   :  { %2050 = vmatprep.subr.bf16.mxu1 %v2401_v6  ;;  %v2408_v13 = vld [vmem:[%s3671_s1 + $0x20] sm:$0xff]   ;;  %v2412_v17 = vld [vmem:[%s3671_s1 + $0x18] sm:$0xff]   ;;  %v2416_v21 = vld [vmem:[%s3671_s1 + $0x10] sm:$0xff]  }
   0x7   :  { %1939 = vmatpush3.bf16.msra.mxu0 %v2400_v5  ;;  %v2409_v14 = vld [vmem:[%s3671_s1 + $0xe0] sm:$0xff]   ;;  %v2413_v18 = vld [vmem:[%s3671_s1 + $0xd8] sm:$0xff]   ;;  %v2417_v22 = vld [vmem:[%s3671_s1 + $0xd0] sm:$0xff]  }
   0x8   :  { %1940 = vmatprep.subr.bf16.mxu0 %v2403_v8  ;;  %v2410_v15 = vld [vmem:[%s3671_s1 + $0xa0] sm:$0xff]   ;;  %v2414_v19 = vld [vmem:[%s3671_s1 + $0x98] sm:$0xff]   ;;  %v2418_v23 = vld [vmem:[%s3671_s1 + $0x90] sm:$0xff]  }
   0x9   :  { %2051 = vmatpush3.bf16.msra.mxu1 %v2402_v7  ;;  %v2419_v24 = vld [vmem:[%s3671_s1 + $0x48] sm:$0xff]   ;;  %v2423_v28 = vld [vmem:[%s3671_s1 + $0x40] sm:$0xff]   ;;  %v28_v36 = vld [vmem:[%s3672_s0 + $0x38] sm:$0xff] }
   0xa   :  { %2052 = vmatprep.subr.bf16.mxu1 %v2405_v10  ;;  %v2420_v25 = vld [vmem:[%s3671_s1 + $0x8] sm:$0xff]   ;;  %v2424_v29 = vld [vmem:[%s3671_s1] sm:$0xff]   ;;  %v2427_v38 = vld [vmem:[%s3671_s1 + $0x178] sm:$0xff]  }
   0xb   :  { %1941 = vmatpush3.bf16.msra.mxu0 %v2404_v9  ;;  %v2421_v26 = vld [vmem:[%s3671_s1 + $0xc8] sm:$0xff]   ;;  %v2425_v30 = vld [vmem:[%s3671_s1 + $0xc0] sm:$0xff]   ;;  %v24_v39 = vld [vmem:[%s3672_s0 + $0x18] sm:$0xff] }
   0xc   :  { %1942 = vmatprep.subr.bf16.mxu0 %v2407_v12  ;;  %v2422_v27 = vld [vmem:[%s3671_s1 + $0x88] sm:$0xff]   ;;  %v29_v32 = vld [vmem:[%s3672_s0 + $0x40] sm:$0xff]  ;;  %v31_v40 = vld [vmem:[%s3672_s0 + $0x50] sm:$0xff] }
   0xd   :  { %2053 = vmatpush3.bf16.msra.mxu1 %v2406_v11  ;;  %v22_v31 = vld [vmem:[%s3672_s0 + $0x8] sm:$0xff]  ;;  %v2426_v34 = vld [vmem:[%s3671_s1 + $0x80] sm:$0xff]   ;;  %v248_v41 = vpack.c.bf16 %v31_v40, %v24_v39  ;;  %v2428_v42 = vld [vmem:[%s3671_s1 + $0x138] sm:$0xff]  }
   0xe   :  { %2054 = vmatprep.subr.bf16.mxu1 %v2409_v14  ;;  %v246_v33 = vpack.c.bf16 %v29_v32, %v22_v31  ;;  %v21_v35 = vld [vmem:[%s3672_s0] sm:$0xff]  ;;  %v23_v43 = vld [vmem:[%s3672_s0 + $0x10] sm:$0xff]  ;;  %v30_v44 = vld [vmem:[%s3672_s0 + $0x48] sm:$0xff] }
   0xf   :  { %1943 = vmatpush3.bf16.msra.mxu0 %v2408_v13  ;;  %v245_v37 = vpack.c.bf16 %v28_v36, %v21_v35  ;;  %v36_v45 = vld [vmem:[%s3672_s0 + $0x78] sm:$0xff]  ;;  %998 = vmatprep.mubr.bf16.mxu1 %v248_v41  ;;  %v247_v46 = vpack.c.bf16 %v30_v44, %v23_v43  ;;  %v43_v47 = vld [vmem:[%s3672_s0 + $0xb0] sm:$0xff]  ;;  %v42_v49 = vld [vmem:[%s3672_s0 + $0xa8] sm:$0xff] }
  0x10   :  { %1944 = vmatprep.subr.bf16.mxu0 %v2411_v16  ;;  %837 = vmatprep.mubr.bf16.mxu0 %v246_v33  ;;  %v35_v48 = vld [vmem:[%s3672_s0 + $0x70] sm:$0xff]  ;;  %v253_v50 = vpack.c.bf16 %v43_v47, %v36_v45  ;;  %v38_v51 = vld [vmem:[%s3672_s0 + $0x88] sm:$0xff]  ;;  %v45_v52 = vld [vmem:[%s3672_s0 + $0xc0] sm:$0xff] }
  0x11   :  { %2055 = vmatpush3.bf16.msra.mxu1 %v2410_v15  ;;  %v255_v53 = vpack.c.bf16 %v45_v52, %v38_v51  ;;  %v50_v54 = vld [vmem:[%s3672_s0 + $0xe8] sm:$0xff]  ;;  %v57_v55 = vld [vmem:[%s3672_s0 + $0x120] sm:$0xff]  ;;  %v252_v56 = vpack.c.bf16 %v42_v49, %v35_v48  ;;  %v44_v58 = vld [vmem:[%s3672_s0 + $0xb8] sm:$0xff] }
  0x12   :  { %2056 = vmatprep.subr.bf16.mxu1 %v2413_v18  ;;  %v37_v57 = vld [vmem:[%s3672_s0 + $0x80] sm:$0xff]  ;;  %v260_v59 = vpack.c.bf16 %v57_v55, %v50_v54  ;;  %v2429_v60 = vld [vmem:[%s3671_s1 + $0x170] sm:$0xff]   ;;  %v52_v61 = vld [vmem:[%s3672_s0 + $0xf8] sm:$0xff] }
  0x13   :  { %1945 = vmatpush3.bf16.msra.mxu0 %v2412_v17  ;;  %v59_v62 = vld [vmem:[%s3672_s0 + $0x130] sm:$0xff]  ;;  %v254_v63 = vpack.c.bf16 %v44_v58, %v37_v57  ;;  %v49_v2 = vld [vmem:[%s3672_s0 + $0xe0] sm:$0xff]  ;;  %v56_v3 = vld [vmem:[%s3672_s0 + $0x118] sm:$0xff] }
  0x14   :  { %1946 = vmatprep.subr.bf16.mxu0 %v2415_v20  ;;  %v2430_v0 = vld [vmem:[%s3671_s1 + $0x130] sm:$0xff]   ;;  %v262_v1 = vpack.c.bf16 %v59_v62, %v52_v61  ;;  %v64_v4 = vld [vmem:[%s3672_s0 + $0x158] sm:$0xff]  ;;  %v58_v7 = vld [vmem:[%s3672_s0 + $0x128] sm:$0xff]  ;;  %v259_v8 = vpack.c.bf16 %v56_v3, %v49_v2 }
  0x15   :  { %2057 = vmatpush3.bf16.msra.mxu1 %v2414_v19  ;;  %v71_v5 = vld [vmem:[%s3672_s0 + $0x190] sm:$0xff]  ;;  %v2431_v9 = vld [vmem:[%s3671_s1 + $0x168] sm:$0xff]   ;;  %v73_v12 = vld [vmem:[%s3672_s0 + $0x1a0] sm:$0xff] }
  0x16   :  { %2058 = vmatprep.subr.bf16.mxu1 %v2417_v22  ;;  %v51_v6 = vld [vmem:[%s3672_s0 + $0xf0] sm:$0xff]  ;;  %v267_v10 = vpack.c.bf16 %v71_v5, %v64_v4  ;;  %v66_v11 = vld [vmem:[%s3672_s0 + $0x168] sm:$0xff]  ;;  %v65_v18 = vld [vmem:[%s3672_s0 + $0x160] sm:$0xff] }
  0x17   :  { %1947 = vmatpush3.bf16.msra.mxu0 %v2416_v21  ;;  %v2432_v13 = vld [vmem:[%s3671_s1 + $0x128] sm:$0xff]   ;;  %v261_v14 = vpack.c.bf16 %v58_v7, %v51_v6  ;;  %v269_v15 = vpack.c.bf16 %v73_v12, %v66_v11  ;;  %v63_v16 = vld [vmem:[%s3672_s0 + $0x150] sm:$0xff]  ;;  %v85_v20 = vld [vmem:[%s3672_s0 + $0x200] sm:$0xff] }
  0x18   :  { %1948 = vmatprep.subr.bf16.mxu0 %v2419_v24  ;;  %v70_v17 = vld [vmem:[%s3672_s0 + $0x188] sm:$0xff]  ;;  %v72_v21 = vld [vmem:[%s3672_s0 + $0x198] sm:$0xff]  ;;  %v87_v24 = vld [vmem:[%s3672_s0 + $0x210] sm:$0xff] }
  0x19   :  { %2059 = vmatpush3.bf16.msra.mxu1 %v2418_v23  ;;  %v78_v19 = vld [vmem:[%s3672_s0 + $0x1c8] sm:$0xff]  ;;  %v266_v22 = vpack.c.bf16 %v70_v17, %v63_v16  ;;  %v80_v23 = vld [vmem:[%s3672_s0 + $0x1d8] sm:$0xff]  ;;  %v99_v33 = vld [vmem:[%s3672_s0 + $0x270] sm:$0xff] }
  0x1a   :  { %2060 = vmatprep.subr.bf16.mxu1 %v2421_v26  ;;  %v274_v26 = vpack.c.bf16 %v85_v20, %v78_v19  ;;  %v84_v31 = vld [vmem:[%s3672_s0 + $0x1f8] sm:$0xff]  ;;  %v94_v39 = vld [vmem:[%s3672_s0 + $0x248] sm:$0xff]  ;;  %v101_v40 = vld [vmem:[%s3672_s0 + $0x280] sm:$0xff] }
  0x1b   :  { %1949 = vmatpush3.bf16.msra.mxu0 %v2420_v25  ;;  %v2433_v25 = vld [vmem:[%s3671_s1 + $0x160] sm:$0xff]   ;;  %v92_v32 = vld [vmem:[%s3672_s0 + $0x238] sm:$0xff]  ;;  %v283_v44 = vpack.c.bf16 %v101_v40, %v94_v39  ;;  %v91_v45 = vld [vmem:[%s3672_s0 + $0x230] sm:$0xff] }
  0x1c   :  { %1950 = vmatprep.subr.bf16.mxu0 %v2423_v28  ;;  %v268_v28 = vpack.c.bf16 %v72_v21, %v65_v18  ;;  %v2435_v35 = vld [vmem:[%s3671_s1 + $0x158] sm:$0xff]   ;;  %v93_v47 = vld [vmem:[%s3672_s0 + $0x240] sm:$0xff]  ;;  %v106_v48 = vld [vmem:[%s3672_s0 + $0x2a8] sm:$0xff] }
  0x1d   :  { %2061 = vmatpush3.bf16.msra.mxu1 %v2422_v27  ;;  %v2434_v27 = vld [vmem:[%s3671_s1 + $0x120] sm:$0xff]   ;;  %v2436_v41 = vld [vmem:[%s3671_s1 + $0x118] sm:$0xff]   ;;  %v115_v55 = vld [vmem:[%s3672_s0 + $0x2f0] sm:$0xff] }
  0x1e   :  { %2062 = vmatprep.subr.bf16.mxu1 %v2425_v30  ;;  %v77_v30 = vld [vmem:[%s3672_s0 + $0x1c0] sm:$0xff]  ;;  %v100_v52 = vld [vmem:[%s3672_s0 + $0x278] sm:$0xff]  ;;  %v127_v62 = vld [vmem:[%s3672_s0 + $0x350] sm:$0xff] }
  0x1f   :  { %1951 = vmatpush3.bf16.msra.mxu0 %v2424_v29  ;;  %v276_v29 = vpack.c.bf16 %v87_v24, %v80_v23  ;;  %v273_v36 = vpack.c.bf16 %v84_v31, %v77_v30  ;;  %v113_v49 = vld [vmem:[%s3672_s0 + $0x2e0] sm:$0xff]  ;;  %v282_v57 = vpack.c.bf16 %v100_v52, %v93_v47  ;;  %v120_v61 = vld [vmem:[%s3672_s0 + $0x318] sm:$0xff]  ;;  %v2441_v3 = vld [vmem:[%s3671_s1 + $0x108] sm:$0xff]  }
  0x20   :  { %2160 = vmatprep.subr.bf16.mxu0 %v2427_v38  ;;  %v281_v38 = vpack.c.bf16 %v99_v33, %v92_v32  ;;  %v288_v54 = vpack.c.bf16 %v113_v49, %v106_v48  ;;  %v295_v4 = vpack.c.bf16 %v127_v62, %v120_v61  ;;  %v122_v5 = vld [vmem:[%s3672_s0 + $0x328] sm:$0xff]  ;;  %v129_v6 = vld [vmem:[%s3672_s0 + $0x360] sm:$0xff]  ;;  %v128_v16 = vld [vmem:[%s3672_s0 + $0x358] sm:$0xff] }
  0x21   :  { %2063 = vmatpush3.bf16.msra.mxu1 %v2426_v34  ;;  %v79_v34 = vld [vmem:[%s3672_s0 + $0x1d0] sm:$0xff]  ;;  %v134_v11 = vld [vmem:[%s3672_s0 + $0x388] sm:$0xff]  ;;  %v141_v12 = vld [vmem:[%s3672_s0 + $0x3c0] sm:$0xff] }
  0x22   :  { %838 = vmatmul.mubr.bf16.vlgmr.msra.gmra.mxu0 %v245_v37  ;;  %v86_v37 = vld [vmem:[%s3672_s0 + $0x208] sm:$0xff]  ;;  %v2443_v17 = vld [vmem:[%s3671_s1 + $0x100] sm:$0xff]   ;;  %v302_v18 = vpack.c.bf16 %v141_v12, %v134_v11  ;;  %v136_v19 = vld [vmem:[%s3672_s0 + $0x398] sm:$0xff] }
  0x23   :  { %2161 = vmatpush3.bf16.msra.mxu0 %v2428_v42  ;;  %845 = vmatprep.mubr.bf16.mxu0 %v253_v50  ;;  %v2437_v42 = vld [vmem:[%s3671_s1 + $0x180] sm:$0xff]   ;;  %v275_v43 = vpack.c.bf16 %v86_v37, %v79_v34  ;;  %v2438_v50 = vld [vmem:[%s3671_s1 + $0x150] sm:$0xff]   ;;  %v140_v24 = vld [vmem:[%s3672_s0 + $0x3b8] sm:$0xff] }
  0x24   :  { %999 = vmatmul.mubr.bf16.vlgmr.msra.gmra.mxu1 %v247_v46  ;;  %2162 = vmatprep.subr.bf16.mxu0 %v2429_v60  ;;  %v98_v46 = vld [vmem:[%s3672_s0 + $0x268] sm:$0xff]  ;;  %v112_v60 = vld [vmem:[%s3672_s0 + $0x2d8] sm:$0xff]  ;;  %v143_v20 = vld [vmem:[%s3672_s0 + $0x3d0] sm:$0xff] }
  0x25   :  { %1006 = vmatprep.mubr.bf16.mxu1 %v255_v53  ;;  %2313 = vmatprep.subr.bf16.mxu1 %v2437_v42  ;;  %v280_v51 = vpack.c.bf16 %v98_v46, %v91_v45  ;;  %v108_v53 = vld [vmem:[%s3672_s0 + $0x2b8] sm:$0xff]  ;;  %v133_v23 = vld [vmem:[%s3672_s0 + $0x380] sm:$0xff]  ;;  %v150_v31 = vld [vmem:[%s3672_s0 + $0x408] sm:$0xff] }
  0x26   :  { %2314 = vmatpush3.bf16.msra.mxu1 %v2437_v42  ;;  %v290_v58 = vpack.c.bf16 %v115_v55, %v108_v53  ;;  %v157_v32 = vld [vmem:[%s3672_s0 + $0x440] sm:$0xff]  ;;  %v162_v37 = vld [vmem:[%s3672_s0 + $0x468] sm:$0xff]  ;;  %v168_v48 = vld [vmem:[%s3672_s0 + $0x498] sm:$0xff] }
  0x27   :  { %2163 = vmatpush3.bf16.msra.mxu0 %v2430_v0  ;;  %v114_v0 = vld [vmem:[%s3672_s0 + $0x2e8] sm:$0xff]  ;;  %v311_v34 = vpack.c.bf16 %v157_v32, %v150_v31  ;;  %v149_v40 = vld [vmem:[%s3672_s0 + $0x400] sm:$0xff]  ;;  %v176_v49 = vld [vmem:[%s3672_s0 + $0x4d8] sm:$0xff] }
  0x28   :  { %2164 = vmatprep.subr.bf16.mxu0 %v2431_v9  ;;  %v297_v9 = vpack.c.bf16 %v129_v6, %v122_v5  ;;  %v161_v47 = vld [vmem:[%s3672_s0 + $0x460] sm:$0xff]  ;;  %v163_v52 = vld [vmem:[%s3672_s0 + $0x470] sm:$0xff]  ;;  %v170_v53 = vld [vmem:[%s3672_s0 + $0x4a8] sm:$0xff] }
  0x29   :  { %v178_v55 = vld [vmem:[%s3672_s0 + $0x4e8] sm:$0xff]  ;;  %v197_v62 = vld [vmem:[%s3672_s0 + $0x580] sm:$0xff]  ;;  %v191_v12 = vld [vmem:[%s3672_s0 + $0x550] sm:$0xff] }
  0x2a   :  { %846 = vmatmul.mubr.bf16.gmra.mxu0 %v252_v56  ;;  %v2439_v56 = vld [vmem:[%s3671_s1 + $0x110] sm:$0xff]   ;;  %v190_v61 = vld [vmem:[%s3672_s0 + $0x548] sm:$0xff]  ;;  %v217_v31 = vld [vmem:[%s3672_s0 + $0x620] sm:$0xff] }
  0x2b   :  { %853 = vmatprep.mubr.bf16.mxu0 %v260_v59  ;;  %2165 = vmatpush3.bf16.msra.mxu0 %v2432_v13  ;;  %v105_v59 = vld [vmem:[%s3672_s0 + $0x2a0] sm:$0xff]  ;;  %v224_v32 = vld [vmem:[%s3672_s0 + $0x658] sm:$0xff] }
  0x2c   :  { %1007 = vmatmul.mubr.bf16.gmra.mxu1 %v254_v63  ;;  %2166 = vmatprep.subr.bf16.mxu0 %v2433_v25  ;;  %v107_v63 = vld [vmem:[%s3672_s0 + $0x2b0] sm:$0xff]  ;;  %v287_v2 = vpack.c.bf16 %v112_v60, %v105_v59  ;;  %v2442_v13 = vld [vmem:[%s3671_s1 + $0x140] sm:$0xff]   ;;  %v148_v25 = vld [vmem:[%s3672_s0 + $0x3f8] sm:$0xff] }
  0x2d   :  { %1014 = vmatprep.mubr.bf16.mxu1 %v262_v1  ;;  %v2440_v1 = vld [vmem:[%s3671_s1 + $0x148] sm:$0xff]   ;;  %v289_v7 = vpack.c.bf16 %v114_v0, %v107_v63  ;;  %v175_v59 = vld [vmem:[%s3672_s0 + $0x4d0] sm:$0xff]  ;;  %v177_v0 = vld [vmem:[%s3672_s0 + $0x4e0] sm:$0xff] }
  0x2e   :  { %v182_v60 = vld [vmem:[%s3672_s0 + $0x508] sm:$0xff] }
  0x2f   :  { %2167 = vmatpush3.bf16.msra.mxu0 %v2434_v27  ;;  %v301_v27 = vpack.c.bf16 %v140_v24, %v133_v23  ;;  %v322_v63 = vpack.c.bf16 %v182_v60, %v175_v59  ;;  %v205_v24 = vld [vmem:[%s3672_s0 + $0x5c0] sm:$0xff] }
  0x30   :  { %2168 = vmatprep.subr.bf16.mxu0 %v2435_v35  ;;  %v147_v35 = vld [vmem:[%s3672_s0 + $0x3f0] sm:$0xff]  ;;  %v41_v60 = vld [vmem:[%s3672_s0 + $0xa0] sm:$0xff] }
  0x32   :  { %854 = vmatmul.mubr.bf16.gmra.mxu0 %v259_v8  ;;  %v119_v8 = vld [vmem:[%s3672_s0 + $0x310] sm:$0xff] }
  0x33   :  { %861 = vmatprep.mubr.bf16.mxu0 %v267_v10  ;;  %2169 = vmatpush3.bf16.msra.mxu0 %v2436_v41  ;;  %v126_v10 = vld [vmem:[%s3672_s0 + $0x348] sm:$0xff]  ;;  %v156_v41 = vld [vmem:[%s3672_s0 + $0x438] sm:$0xff] }
  0x34   :  { %1015 = vmatmul.mubr.bf16.gmra.mxu1 %v261_v14  ;;  %2170 = vmatprep.subr.bf16.mxu0 %v2438_v50  ;;  %v294_v14 = vpack.c.bf16 %v126_v10, %v119_v8  ;;  %v310_v45 = vpack.c.bf16 %v156_v41, %v149_v40  ;;  %v183_v50 = vld [vmem:[%s3672_s0 + $0x510] sm:$0xff]  ;;  %v196_v8 = vld [vmem:[%s3672_s0 + $0x578] sm:$0xff]  ;;  %v241_v40 = vld [vmem:[%s3672_s0 + $0x6e0] sm:$0xff] }
  0x35   :  { %1022 = vmatprep.mubr.bf16.mxu1 %v269_v15  ;;  %v121_v15 = vld [vmem:[%s3672_s0 + $0x320] sm:$0xff]  ;;  %v211_v10 = vld [vmem:[%s3672_s0 + $0x5f0] sm:$0xff] }
  0x36   :  { %v296_v21 = vpack.c.bf16 %v128_v16, %v121_v15  ;;  %v206_v15 = vld [vmem:[%s3672_s0 + $0x5c8] sm:$0xff]  ;;  %v213_v16 = vld [vmem:[%s3672_s0 + $0x600] sm:$0xff] }
  0x37   :  { %2171 = vmatpush3.bf16.msra.mxu0 %v2439_v56  ;;  %v185_v56 = vld [vmem:[%s3672_s0 + $0x520] sm:$0xff] }
  0x38   :  { %2172 = vmatprep.subr.bf16.mxu0 %v2440_v1  ;;  %v184_v1 = vld [vmem:[%s3672_s0 + $0x518] sm:$0xff] }
  0x39   :  { %v324_v5 = vpack.c.bf16 %v184_v1, %v177_v0  ;;  %v62_v0 = vld [vmem:[%s3672_s0 + $0x148] sm:$0xff] }
  0x3a   :  { %862 = vmatmul.mubr.bf16.gmra.mxu0 %v266_v22  ;;  %v304_v22 = vpack.c.bf16 %v143_v20, %v136_v19  ;;  %v203_v19 = vld [vmem:[%s3672_s0 + $0x5b0] sm:$0xff]  ;;  %v210_v20 = vld [vmem:[%s3672_s0 + $0x5e8] sm:$0xff] }
  0x3b   :  { %869 = vmatprep.mubr.bf16.mxu0 %v274_v26  ;;  %2173 = vmatpush3.bf16.msra.mxu0 %v2441_v3  ;;  %v155_v26 = vld [vmem:[%s3672_s0 + $0x430] sm:$0xff]  ;;  %v192_v3 = vld [vmem:[%s3672_s0 + $0x558] sm:$0xff]  ;;  %v336_v23 = vpack.c.bf16 %v210_v20, %v203_v19  ;;  %v97_v20 = vld [vmem:[%s3672_s0 + $0x260] sm:$0xff] }
  0x3c   :  { %1023 = vmatmul.mubr.bf16.gmra.mxu1 %v268_v28  ;;  %2174 = vmatprep.subr.bf16.mxu0 %v2442_v13  ;;  %v135_v28 = vld [vmem:[%s3672_s0 + $0x390] sm:$0xff]  ;;  %v309_v30 = vpack.c.bf16 %v155_v26, %v148_v25  ;;  %v198_v13 = vld [vmem:[%s3672_s0 + $0x588] sm:$0xff]  ;;  %v212_v25 = vld [vmem:[%s3672_s0 + $0x5f8] sm:$0xff] }
  0x3d   :  { %1030 = vmatprep.mubr.bf16.mxu1 %v276_v29  ;;  %v142_v29 = vld [vmem:[%s3672_s0 + $0x3c8] sm:$0xff] }
  0x3e   :  { %v303_v33 = vpack.c.bf16 %v142_v29, %v135_v28  ;;  %v227_v28 = vld [vmem:[%s3672_s0 + $0x670] sm:$0xff]  ;;  %v338_v29 = vpack.c.bf16 %v212_v25, %v205_v24  ;;  %v118_v24 = vld [vmem:[%s3672_s0 + $0x308] sm:$0xff] }
  0x3f   :  { %2175 = vmatpush3.bf16.msra.mxu0 %v2443_v17  ;;  %v331_v17 = vpack.c.bf16 %v198_v13, %v191_v12  ;;  %v90_v12 = vld [vmem:[%s3672_s0 + $0x228] sm:$0xff] }
  0x42   :  { %870 = vmatmul.mubr.bf16.gmra.mxu0 %v273_v36  ;;  %v154_v36 = vld [vmem:[%s3672_s0 + $0x428] sm:$0xff] }
  0x43   :  { %877 = vmatprep.mubr.bf16.mxu0 %v281_v38  ;;  %v169_v38 = vld [vmem:[%s3672_s0 + $0x4a0] sm:$0xff]  ;;  %v308_v39 = vpack.c.bf16 %v154_v36, %v147_v35  ;;  %v343_v35 = vpack.c.bf16 %v224_v32, %v217_v31  ;;  %v219_v36 = vld [vmem:[%s3672_s0 + $0x630] sm:$0xff] }
  0x44   :  { %1031 = vmatmul.mubr.bf16.gmra.mxu1 %v275_v43  ;;  %v316_v42 = vpack.c.bf16 %v169_v38, %v162_v37  ;;  %v164_v43 = vld [vmem:[%s3672_s0 + $0x478] sm:$0xff]  ;;  %v226_v37 = vld [vmem:[%s3672_s0 + $0x668] sm:$0xff]  ;;  %v125_v32 = vld [vmem:[%s3672_s0 + $0x340] sm:$0xff] }
  0x45   :  { %1038 = vmatprep.mubr.bf16.mxu1 %v283_v44  ;;  %v171_v44 = vld [vmem:[%s3672_s0 + $0x4b0] sm:$0xff]  ;;  %v345_v41 = vpack.c.bf16 %v226_v37, %v219_v36  ;;  %v146_v36 = vld [vmem:[%s3672_s0 + $0x3e8] sm:$0xff] }
  0x46   :  { %v318_v46 = vpack.c.bf16 %v171_v44, %v164_v43  ;;  %v231_v43 = vld [vmem:[%s3672_s0 + $0x690] sm:$0xff]  ;;  %v238_v44 = vld [vmem:[%s3672_s0 + $0x6c8] sm:$0xff] }
  0x4a   :  { %878 = vmatmul.mubr.bf16.gmra.mxu0 %v280_v51  ;;  %v315_v51 = vpack.c.bf16 %v168_v48, %v161_v47  ;;  %v350_v47 = vpack.c.bf16 %v238_v44, %v231_v43  ;;  %v233_v48 = vld [vmem:[%s3672_s0 + $0x6a0] sm:$0xff] }
  0x4b   :  { %885 = vmatprep.mubr.bf16.mxu0 %v288_v54  ;;  %v323_v54 = vpack.c.bf16 %v183_v50, %v176_v49  ;;  %v240_v49 = vld [vmem:[%s3672_s0 + $0x6d8] sm:$0xff]  ;;  %v153_v44 = vld [vmem:[%s3672_s0 + $0x420] sm:$0xff] }
  0x4c   :  { %1039 = vmatmul.mubr.bf16.gmra.mxu1 %v282_v57  ;;  %v317_v57 = vpack.c.bf16 %v170_v53, %v163_v52  ;;  %v34_v52 = vld [vmem:[%s3672_s0 + $0x68] sm:$0xff]  ;;  %v352_v53 = vpack.c.bf16 %v240_v49, %v233_v48 }
  0x4d   :  { %1046 = vmatprep.mubr.bf16.mxu1 %v290_v58  ;;  %v325_v58 = vpack.c.bf16 %v185_v56, %v178_v55  ;;  %v25_v55 = vld [vmem:[%s3672_s0 + $0x20] sm:$0xff]  ;;  %v32_v56 = vld [vmem:[%s3672_s0 + $0x58] sm:$0xff]  ;;  %v174_v48 = vld [vmem:[%s3672_s0 + $0x4c8] sm:$0xff] }
  0x4e   :  { %v249_v59 = vpack.c.bf16 %v32_v56, %v25_v55  ;;  %v181_v56 = vld [vmem:[%s3672_s0 + $0x500] sm:$0xff] }
  0x52   :  { %886 = vmatmul.mubr.bf16.gmra.mxu0 %v287_v2  ;;  %v330_v2 = vpack.c.bf16 %v197_v62, %v190_v61  ;;  %v48_v61 = vld [vmem:[%s3672_s0 + $0xd8] sm:$0xff] }
  0x53   :  { %893 = vmatprep.mubr.bf16.mxu0 %v295_v4  ;;  %v199_v4 = vld [vmem:[%s3672_s0 + $0x590] sm:$0xff]  ;;  %v258_v1 = vpack.c.bf16 %v48_v61, %v41_v60  ;;  %v202_v60 = vld [vmem:[%s3672_s0 + $0x5a8] sm:$0xff] }
  0x54   :  { %1047 = vmatmul.mubr.bf16.gmra.mxu1 %v289_v7  ;;  %v332_v6 = vpack.c.bf16 %v199_v4, %v192_v3  ;;  %v189_v7 = vld [vmem:[%s3672_s0 + $0x540] sm:$0xff]  ;;  %v39_v3 = vld [vmem:[%s3672_s0 + $0x90] sm:$0xff]  ;;  %v46_v4 = vld [vmem:[%s3672_s0 + $0xc8] sm:$0xff] }
  0x55   :  { %1054 = vmatprep.mubr.bf16.mxu1 %v297_v9  ;;  %v204_v9 = vld [vmem:[%s3672_s0 + $0x5b8] sm:$0xff]  ;;  %v329_v11 = vpack.c.bf16 %v196_v8, %v189_v7  ;;  %v256_v7 = vpack.c.bf16 %v46_v4, %v39_v3  ;;  %v69_v8 = vld [vmem:[%s3672_s0 + $0x180] sm:$0xff] }
  0x56   :  { %v209_v4 = vld [vmem:[%s3672_s0 + $0x5e0] sm:$0xff] }
  0x5a   :  { %894 = vmatmul.mubr.bf16.gmra.mxu0 %v294_v14  ;;  %v337_v14 = vpack.c.bf16 %v211_v10, %v204_v9  ;;  %v76_v9 = vld [vmem:[%s3672_s0 + $0x1b8] sm:$0xff] }
  0x5b   :  { %901 = vmatprep.mubr.bf16.mxu0 %v302_v18  ;;  %v339_v18 = vpack.c.bf16 %v213_v16, %v206_v15  ;;  %v272_v13 = vpack.c.bf16 %v76_v9, %v69_v8  ;;  %v53_v15 = vld [vmem:[%s3672_s0 + $0x100] sm:$0xff]  ;;  %v60_v16 = vld [vmem:[%s3672_s0 + $0x138] sm:$0xff]  ;;  %v230_v8 = vld [vmem:[%s3672_s0 + $0x688] sm:$0xff] }
  0x5c   :  { %1055 = vmatmul.mubr.bf16.gmra.mxu1 %v296_v21  ;;  %v218_v21 = vld [vmem:[%s3672_s0 + $0x628] sm:$0xff]  ;;  %v263_v19 = vpack.c.bf16 %v60_v16, %v53_v15  ;;  %v237_v16 = vld [vmem:[%s3672_s0 + $0x6c0] sm:$0xff] }
  0x5d   :  { %1062 = vmatprep.mubr.bf16.mxu1 %v304_v22  ;;  %v225_v22 = vld [vmem:[%s3672_s0 + $0x660] sm:$0xff] }
  0x5e   :  { %v344_v26 = vpack.c.bf16 %v225_v22, %v218_v21  ;;  %v104_v21 = vld [vmem:[%s3672_s0 + $0x298] sm:$0xff] }
  0x5f   :  { %v286_v25 = vpack.c.bf16 %v104_v21, %v97_v20  ;;  %v137_v20 = vld [vmem:[%s3672_s0 + $0x3a0] sm:$0xff]  ;;  %v144_v21 = vld [vmem:[%s3672_s0 + $0x3d8] sm:$0xff] }
  0x62   :  { %902 = vmatmul.mubr.bf16.gmra.mxu0 %v301_v27  ;;  %v220_v27 = vld [vmem:[%s3672_s0 + $0x638] sm:$0xff] }
  0x63   :  { %909 = vmatprep.mubr.bf16.mxu0 %v309_v30  ;;  %v346_v30 = vpack.c.bf16 %v227_v28, %v220_v27  ;;  %v67_v27 = vld [vmem:[%s3672_s0 + $0x170] sm:$0xff]  ;;  %v74_v28 = vld [vmem:[%s3672_s0 + $0x1a8] sm:$0xff] }
  0x64   :  { %1063 = vmatmul.mubr.bf16.gmra.mxu1 %v303_v33  ;;  %v232_v33 = vld [vmem:[%s3672_s0 + $0x698] sm:$0xff]  ;;  %v270_v31 = vpack.c.bf16 %v74_v28, %v67_v27  ;;  %v151_v27 = vld [vmem:[%s3672_s0 + $0x410] sm:$0xff]  ;;  %v158_v28 = vld [vmem:[%s3672_s0 + $0x448] sm:$0xff] }
  0x65   :  { %1070 = vmatprep.mubr.bf16.mxu1 %v311_v34  ;;  %v239_v34 = vld [vmem:[%s3672_s0 + $0x6d0] sm:$0xff] }
  0x66   :  { %v351_v38 = vpack.c.bf16 %v239_v34, %v232_v33  ;;  %v132_v33 = vld [vmem:[%s3672_s0 + $0x378] sm:$0xff] }
  0x67   :  { %v300_v37 = vpack.c.bf16 %v132_v33, %v125_v32  ;;  %v173_v32 = vld [vmem:[%s3672_s0 + $0x4c0] sm:$0xff] }
  0x6a   :  { %910 = vmatmul.mubr.bf16.gmra.mxu0 %v308_v39  ;;  %v234_v39 = vld [vmem:[%s3672_s0 + $0x6a8] sm:$0xff] }
  0x6b   :  { %917 = vmatprep.mubr.bf16.mxu0 %v316_v42  ;;  %v353_v42 = vpack.c.bf16 %v241_v40, %v234_v39  ;;  %v81_v39 = vld [vmem:[%s3672_s0 + $0x1e0] sm:$0xff]  ;;  %v88_v40 = vld [vmem:[%s3672_s0 + $0x218] sm:$0xff] }
  0x6c   :  { %1071 = vmatmul.mubr.bf16.gmra.mxu1 %v310_v45  ;;  %v26_v45 = vld [vmem:[%s3672_s0 + $0x28] sm:$0xff]  ;;  %v277_v43 = vpack.c.bf16 %v88_v40, %v81_v39 }
  0x6d   :  { %1078 = vmatprep.mubr.bf16.mxu1 %v318_v46  ;;  %v33_v46 = vld [vmem:[%s3672_s0 + $0x60] sm:$0xff] }
  0x6e   :  { %v250_v50 = vpack.c.bf16 %v33_v46, %v26_v45  ;;  %v160_v45 = vld [vmem:[%s3672_s0 + $0x458] sm:$0xff] }
  0x6f   :  { %v314_v49 = vpack.c.bf16 %v160_v45, %v153_v44 }
  0x72   :  { %918 = vmatmul.mubr.bf16.gmra.mxu0 %v315_v51  ;;  %v27_v51 = vld [vmem:[%s3672_s0 + $0x30] sm:$0xff] }
  0x73   :  { %925 = vmatprep.mubr.bf16.mxu0 %v323_v54  ;;  %v251_v54 = vpack.c.bf16 %v34_v52, %v27_v51  ;;  %v95_v51 = vld [vmem:[%s3672_s0 + $0x250] sm:$0xff]  ;;  %v102_v52 = vld [vmem:[%s3672_s0 + $0x288] sm:$0xff] }
  0x74   :  { %1079 = vmatmul.mubr.bf16.gmra.mxu1 %v317_v57  ;;  %v40_v57 = vld [vmem:[%s3672_s0 + $0x98] sm:$0xff]  ;;  %v284_v55 = vpack.c.bf16 %v102_v52, %v95_v51  ;;  %v187_v51 = vld [vmem:[%s3672_s0 + $0x530] sm:$0xff] }
  0x75   :  { %1086 = vmatprep.mubr.bf16.mxu1 %v325_v58  ;;  %v47_v58 = vld [vmem:[%s3672_s0 + $0xd0] sm:$0xff] }
  0x76   :  { %v257_v62 = vpack.c.bf16 %v47_v58, %v40_v57  ;;  %v188_v57 = vld [vmem:[%s3672_s0 + $0x538] sm:$0xff] }
  0x77   :  { %v328_v61 = vpack.c.bf16 %v188_v57, %v181_v56 }
  0x7a   :  { %926 = vmatmul.mubr.bf16.gmra.mxu0 %v322_v63  ;;  %v55_v63 = vld [vmem:[%s3672_s0 + $0x110] sm:$0xff] }
  0x7b   :  { %933 = vmatprep.mubr.bf16.mxu0 %v330_v2  ;;  %v265_v2 = vpack.c.bf16 %v62_v0, %v55_v63  ;;  %v109_v63 = vld [vmem:[%s3672_s0 + $0x2c0] sm:$0xff]  ;;  %v116_v0 = vld [vmem:[%s3672_s0 + $0x2f8] sm:$0xff] }
  0x7c   :  { %1087 = vmatmul.mubr.bf16.gmra.mxu1 %v324_v5  ;;  %v54_v5 = vld [vmem:[%s3672_s0 + $0x108] sm:$0xff]  ;;  %v291_v3 = vpack.c.bf16 %v116_v0, %v109_v63 }
  0x7d   :  { %1094 = vmatprep.mubr.bf16.mxu1 %v332_v6  ;;  %v61_v6 = vld [vmem:[%s3672_s0 + $0x140] sm:$0xff] }
  0x7e   :  { %v264_v10 = vpack.c.bf16 %v61_v6, %v54_v5  ;;  %v216_v5 = vld [vmem:[%s3672_s0 + $0x618] sm:$0xff] }
  0x7f   :  { %v342_v9 = vpack.c.bf16 %v216_v5, %v209_v4 }
  0x82   :  { %934 = vmatmul.mubr.bf16.gmra.mxu0 %v329_v11  ;;  %v83_v11 = vld [vmem:[%s3672_s0 + $0x1f0] sm:$0xff] }
  0x83   :  { %941 = vmatprep.mubr.bf16.mxu0 %v337_v14  ;;  %v279_v14 = vpack.c.bf16 %v90_v12, %v83_v11  ;;  %v123_v11 = vld [vmem:[%s3672_s0 + $0x330] sm:$0xff]  ;;  %v130_v12 = vld [vmem:[%s3672_s0 + $0x368] sm:$0xff] }
  0x84   :  { %1095 = vmatmul.mubr.bf16.gmra.mxu1 %v331_v17  ;;  %v68_v17 = vld [vmem:[%s3672_s0 + $0x178] sm:$0xff]  ;;  %v298_v15 = vpack.c.bf16 %v130_v12, %v123_v11  ;;  %v194_v12 = vld [vmem:[%s3672_s0 + $0x568] sm:$0xff] }
  0x85   :  { %1102 = vmatprep.mubr.bf16.mxu1 %v339_v18  ;;  %v75_v18 = vld [vmem:[%s3672_s0 + $0x1b0] sm:$0xff] }
  0x86   :  { %v271_v22 = vpack.c.bf16 %v75_v18, %v68_v17  ;;  %v244_v17 = vld [vmem:[%s3672_s0 + $0x6f8] sm:$0xff] }
  0x8a   :  { %942 = vmatmul.mubr.bf16.gmra.mxu0 %v336_v23  ;;  %v111_v23 = vld [vmem:[%s3672_s0 + $0x2d0] sm:$0xff] }
  0x8b   :  { %949 = vmatprep.mubr.bf16.mxu0 %v344_v26  ;;  %v293_v26 = vpack.c.bf16 %v118_v24, %v111_v23  ;;  %v159_v23 = vld [vmem:[%s3672_s0 + $0x450] sm:$0xff]  ;;  %v305_v24 = vpack.c.bf16 %v144_v21, %v137_v20 }
  0x8c   :  { %1103 = vmatmul.mubr.bf16.gmra.mxu1 %v338_v29  ;;  %v82_v29 = vld [vmem:[%s3672_s0 + $0x1e8] sm:$0xff] }
  0x8d   :  { %1110 = vmatprep.mubr.bf16.mxu1 %v346_v30  ;;  %v89_v30 = vld [vmem:[%s3672_s0 + $0x220] sm:$0xff] }
  0x8e   :  { %v278_v34 = vpack.c.bf16 %v89_v30, %v82_v29  ;;  %v3312_v29 = vld [vmem:[%s3673_s2] ss:$0 sm:$0xff] }
  0x92   :  { %950 = vmatmul.mubr.bf16.gmra.mxu0 %v343_v35  ;;  %v139_v35 = vld [vmem:[%s3672_s0 + $0x3b0] sm:$0xff] }
  0x93   :  { %957 = vmatprep.mubr.bf16.mxu0 %v351_v38  ;;  %v307_v38 = vpack.c.bf16 %v146_v36, %v139_v35  ;;  %v312_v36 = vpack.c.bf16 %v158_v28, %v151_v27 }
  0x94   :  { %1111 = vmatmul.mubr.bf16.gmra.mxu1 %v345_v41  ;;  %v96_v41 = vld [vmem:[%s3672_s0 + $0x258] sm:$0xff] }
  0x95   :  { %1118 = vmatprep.mubr.bf16.mxu1 %v353_v42  ;;  %v103_v42 = vld [vmem:[%s3672_s0 + $0x290] sm:$0xff] }
  0x96   :  { %v285_v46 = vpack.c.bf16 %v103_v42, %v96_v41 }
  0x9a   :  { %958 = vmatmul.mubr.bf16.gmra.mxu0 %v350_v47  ;;  %v167_v47 = vld [vmem:[%s3672_s0 + $0x490] sm:$0xff] }
  0x9b   :  { %1159 = vmatprep.mubr.bf16.mxu0 %v250_v50  ;;  %v321_v50 = vpack.c.bf16 %v174_v48, %v167_v47 }
  0x9c   :  { %1119 = vmatmul.mubr.bf16.gmra.mxu1 %v352_v53  ;;  %v110_v53 = vld [vmem:[%s3672_s0 + $0x2c8] sm:$0xff] }
  0x9d   :  { %2315 = vmatprep.mubr.msk.bf16.mxu1 %vm756_vm0, %v251_v54  ;;  %v117_v54 = vld [vmem:[%s3672_s0 + $0x300] sm:$0xff] }
  0x9e   :  { %v292_v58 = vpack.c.bf16 %v117_v54, %v110_v53  ;;  %v2444_v54 = vld [vmem:[%s3674_s3 + $0x38] sm:$0xff]  }
  0x9f   :  { %2347 = vmatprep.subr.bf16.mxu1 %v2444_v54 }
  0xa2   :  { %1160 = vmatmul.mubr.bf16.vlgmr.msra.gmra.mxu0 %v249_v59  ;;  %v195_v59 = vld [vmem:[%s3672_s0 + $0x570] sm:$0xff] }
  0xa3   :  { %1167 = vmatprep.mubr.bf16.mxu0 %v257_v62  ;;  %v335_v62 = vpack.c.bf16 %v202_v60, %v195_v59 }
  0xa4   :  { %2316 = vmatmul.mubr.msk.bf16.vlgmr.msra.gmra.mxu1 %vm756_vm0, %v258_v1  ;;  %v124_v1 = vld [vmem:[%s3672_s0 + $0x338] sm:$0xff] }
  0xa5   :  { %2319 = vmatprep.mubr.msk.bf16.mxu1 %vm756_vm0, %v265_v2  ;;  %v131_v2 = vld [vmem:[%s3672_s0 + $0x370] sm:$0xff]  ;;  %2348 = vmatpush3.bf16.msra.mxu1 %v2444_v54 }
  0xa6   :  { %v299_v6 = vpack.c.bf16 %v131_v2, %v124_v1  ;;  %v2445_v1 = vld [vmem:[%s3674_s3 + $0x30] sm:$0xff]  }
  0xa7   :  { %2349 = vmatprep.subr.bf16.mxu1 %v2445_v1 }
  0xa9   :  { %2350 = vmatpush3.bf16.msra.mxu1 %v2445_v1  ;;  %v2450_v1 = vld [vmem:[%s3674_s3 + $0x8] sm:$0xff]  }
  0xaa   :  { %1168 = vmatmul.mubr.bf16.gmra.mxu0 %v256_v7  ;;  %v223_v7 = vld [vmem:[%s3672_s0 + $0x650] sm:$0xff] }
  0xab   :  { %1175 = vmatprep.mubr.bf16.mxu0 %v264_v10  ;;  %v349_v10 = vpack.c.bf16 %v230_v8, %v223_v7  ;;  %v179_v8 = vld [vmem:[%s3672_s0 + $0x4f0] sm:$0xff] }
  0xac   :  { %2320 = vmatmul.mubr.msk.bf16.gmra.mxu1 %vm756_vm0, %v272_v13  ;;  %v138_v13 = vld [vmem:[%s3672_s0 + $0x3a8] sm:$0xff] }
  0xad   :  { %2323 = vmatprep.mubr.msk.bf16.mxu1 %vm756_vm0, %v279_v14  ;;  %v145_v14 = vld [vmem:[%s3672_s0 + $0x3e0] sm:$0xff] }
  0xae   :  { %v306_v18 = vpack.c.bf16 %v145_v14, %v138_v13  ;;  %v201_v13 = vld [vmem:[%s3672_s0 + $0x5a0] sm:$0xff]  ;;  %v2446_v14 = vld [vmem:[%s3674_s3 + $0x28] sm:$0xff]  }
  0xaf   :  { %2351 = vmatprep.subr.bf16.mxu1 %v2446_v14 }
  0xb0   :  { %2352 = vmatpush3.bf16.msra.mxu1 %v2446_v14 }
  0xb2   :  { %1176 = vmatmul.mubr.bf16.gmra.mxu0 %v263_v19  ;;  %v356_v19 = vpack.c.bf16 %v244_v17, %v237_v16 }
  0xb3   :  { %1183 = vmatprep.mubr.bf16.mxu0 %v271_v22  ;;  %v152_v22 = vld [vmem:[%s3672_s0 + $0x418] sm:$0xff] }
  0xb4   :  { %2324 = vmatmul.mubr.msk.bf16.gmra.mxu1 %vm756_vm0, %v286_v25  ;;  %v313_v25 = vpack.c.bf16 %v159_v23, %v152_v22  ;;  %v334_v22 = vpack.c.bf16 %v201_v13, %v194_v12  ;;  %v2451_v13 = vld [vmem:[%s3674_s3] sm:$0xff]  }
  0xb5   :  { %2327 = vmatprep.mubr.msk.bf16.mxu1 %vm756_vm0, %v293_v26 }
  0xba   :  { %1184 = vmatmul.mubr.bf16.gmra.mxu0 %v270_v31  ;;  %v166_v31 = vld [vmem:[%s3672_s0 + $0x488] sm:$0xff] }
  0xbb   :  { %1191 = vmatprep.mubr.bf16.mxu0 %v278_v34  ;;  %v320_v39 = vpack.c.bf16 %v173_v32, %v166_v31 }
  0xbc   :  { %2328 = vmatmul.mubr.msk.bf16.gmra.mxu1 %vm756_vm0, %v300_v37 }
  0xbd   :  { %2331 = vmatprep.mubr.msk.bf16.mxu1 %vm756_vm0, %v307_v38 }
  0xc2   :  { %1192 = vmatmul.mubr.bf16.gmra.mxu0 %v277_v43 }
  0xc3   :  { %1199 = vmatprep.mubr.bf16.mxu0 %v285_v46  ;;  %v165_v46 = vld [vmem:[%s3672_s0 + $0x480] sm:$0xff] }
  0xc4   :  { %2332 = vmatmul.mubr.msk.bf16.gmra.mxu1 %vm756_vm0, %v314_v49  ;;  %v172_v49 = vld [vmem:[%s3672_s0 + $0x4b8] sm:$0xff] }
  0xc5   :  { %2335 = vmatprep.mubr.msk.bf16.mxu1 %vm756_vm0, %v321_v50  ;;  %v180_v50 = vld [vmem:[%s3672_s0 + $0x4f8] sm:$0xff]  ;;  %v319_v59 = vpack.c.bf16 %v172_v49, %v165_v46 }
  0xca   :  { %1200 = vmatmul.mubr.bf16.gmra.mxu0 %v284_v55 }
  0xcb   :  { %1207 = vmatprep.mubr.bf16.mxu0 %v292_v58 }
  0xcc   :  { %2336 = vmatmul.mubr.msk.bf16.gmra.mxu1 %vm756_vm0, %v328_v61 }
  0xcd   :  { %2339 = vmatprep.mubr.msk.bf16.mxu1 %vm756_vm0, %v335_v62  ;;  %v327_v62 = vpack.c.bf16 %v187_v51, %v180_v50  ;;  %v2449_v51 = vld [vmem:[%s3674_s3 + $0x10] sm:$0xff]  }
  0xd2   :  { %1208 = vmatmul.mubr.bf16.gmra.mxu0 %v291_v3 }
  0xd3   :  { %1215 = vmatprep.mubr.bf16.mxu0 %v299_v6 }
  0xd4   :  { %2340 = vmatmul.mubr.msk.bf16.gmra.mxu1 %vm756_vm0, %v342_v9  ;;  %v186_v9 = vld [vmem:[%s3672_s0 + $0x528] sm:$0xff] }
  0xd5   :  { %2343 = vmatprep.mubr.msk.bf16.mxu1 %vm756_vm0, %v349_v10 }
  0xda   :  { %1216 = vmatmul.mubr.bf16.gmra.mxu0 %v298_v15 }
  0xdb   :  { %1223 = vmatprep.mubr.bf16.mxu0 %v306_v18 }
  0xdc   :  { %2344 = vmatmul.mubr.msk.bf16.gmra.mxu1 %vm756_vm0, %v356_v19  ;;  %v326_v19 = vpack.c.bf16 %v186_v9, %v179_v8 }
  0xe2   :  { %v1952_v26 = vpop.f32.mrf.mxu0  ;;  %1224 = vmatmul.mubr.bf16.gmra.mxu0 %v305_v24 }
  0xe3   :  { %1231 = vmatprep.mubr.bf16.mxu0 %v313_v25  ;;  %v2447_v25 = vld [vmem:[%s3674_s3 + $0x20] sm:$0xff]  }
  0xe4   :  { %v1953_v30 = vpop.f32.mrf.mxu0  ;;  %v2064_v34 = vpop.f32.mrf.mxu1  ;;  %2353 = vmatprep.subr.bf16.mxu1 %v2447_v25 }
  0xe5   :  { %v1954_v33 = vadd.f32 %v1953_v30, %v1952_v26  ;;  %2354 = vmatpush3.bf16.msra.mxu1 %v2447_v25  ;;  %v236_v25 = vld [vmem:[%s3672_s0 + $0x6b8] sm:$0xff] }
  0xe6   :  { %v1955_v35 = vpop.f32.mrf.mxu0  ;;  %v2065_v38 = vpop.f32.mrf.mxu1 }
  0xe7   :  { %v840_v37 = vadd.f32 %v1954_v33, %v3312_v29  ;;  %v2066_v40 = vadd.f32 %v2065_v38, %v2064_v34  ;;  %v193_v33 = vld [vmem:[%s3672_s0 + $0x560] sm:$0xff]  ;;  %v200_v34 = vld [vmem:[%s3672_s0 + $0x598] sm:$0xff]  ;;  %v215_v38 = vld [vmem:[%s3672_s0 + $0x610] sm:$0xff] }
  0xe8   :  { %v1956_v41 = vpop.f32.mrf.mxu0  ;;  %v2067_v43 = vpop.f32.mrf.mxu1 }
  0xe9   :  { %v1957_v42 = vadd.f32 %v1956_v41, %v1955_v35  ;;  %v3321_v44 = vadd.f32 %v2066_v40, %v840_v37  ;;  %v208_v37 = vld [vmem:[%s3672_s0 + $0x5d8] sm:$0xff] }
  0xea   :  { %v1958_v45 = vpop.f32.mrf.mxu0  ;;  %1232 = vmatmul.mubr.bf16.gmra.mxu0 %v312_v36  ;;  %v2068_v48 = vpop.f32.mrf.mxu1 }
  0xeb   :  { %v843_v47 = vadd.f32 %v1957_v42, %v3312_v29  ;;  %1239 = vmatprep.mubr.bf16.mxu0 %v320_v39  ;;  %v2069_v52 = vadd.f32 %v2068_v48, %v2067_v43  ;;  %v2448_v39 = vld [vmem:[%s3674_s3 + $0x18] sm:$0xff]   ;;  %v341_v48 = vpack.c.bf16 %v215_v38, %v208_v37 }
  0xec   :  { %v1959_v53 = vpop.f32.mrf.mxu0  ;;  %v2070_v56 = vpop.f32.mrf.mxu1  ;;  %2355 = vmatprep.subr.bf16.mxu1 %v2448_v39 }
  0xed   :  { %v1960_v55 = vadd.f32 %v1959_v53, %v1958_v45  ;;  %v3339_v57 = vadd.f32 %v2069_v52, %v843_v47  ;;  %v333_v45 = vpack.c.bf16 %v200_v34, %v193_v33  ;;  %2356 = vmatpush3.bf16.msra.mxu1 %v2448_v39 }
  0xee   :  { %v1961_v58 = vpop.f32.mrf.mxu0  ;;  %v2071_v61 = vpop.f32.mrf.mxu1  ;;  %2357 = vmatprep.subr.bf16.mxu1 %v2449_v51 }
  0xef   :  { %v848_v60 = vadd.f32 %v1960_v55, %v3312_v29  ;;  %v2072_v63 = vadd.f32 %v2071_v61, %v2070_v56 }
  0xf0   :  { %v1962_v0 = vpop.f32.mrf.mxu0  ;;  %v2073_v3 = vpop.f32.mrf.mxu1 }
  0xf1   :  { %v1963_v2 = vadd.f32 %v1962_v0, %v1961_v58  ;;  %v3345_v4 = vadd.f32 %v2072_v63, %v848_v60  ;;  %v214_v60 = vld [vmem:[%s3672_s0 + $0x608] sm:$0xff]  ;;  %2358 = vmatpush3.bf16.msra.mxu1 %v2449_v51  ;;  %v229_v0 = vld [vmem:[%s3672_s0 + $0x680] sm:$0xff] }
  0xf2   :  { %v1964_v5 = vpop.f32.mrf.mxu0  ;;  %1240 = vmatmul.mubr.bf16.gmra.mxu0 %v319_v59  ;;  %v2074_v7 = vpop.f32.mrf.mxu1  ;;  %v207_v59 = vld [vmem:[%s3672_s0 + $0x5d0] sm:$0xff]  ;;  %v222_v63 = vld [vmem:[%s3672_s0 + $0x648] sm:$0xff]  ;;  %2359 = vmatprep.subr.bf16.mxu1 %v2450_v1 }
  0xf3   :  { %v851_v6 = vadd.f32 %v1963_v2, %v3312_v29  ;;  %1247 = vmatprep.mubr.bf16.mxu0 %v327_v62  ;;  %v2075_v10 = vadd.f32 %v2074_v7, %v2073_v3  ;;  %v340_v7 = vpack.c.bf16 %v214_v60, %v207_v59 }
  0xf4   :  { %v1965_v11 = vpop.f32.mrf.mxu0  ;;  %v2076_v16 = vpop.f32.mrf.mxu1 }
  0xf5   :  { %v1966_v15 = vadd.f32 %v1965_v11, %v1964_v5  ;;  %v3363_v17 = vadd.f32 %v2075_v10, %v851_v6  ;;  %v348_v10 = vpack.c.bf16 %v229_v0, %v222_v63  ;;  %2360 = vmatpush3.bf16.msra.mxu1 %v2450_v1 }
  0xf6   :  { %v1967_v18 = vpop.f32.mrf.mxu0  ;;  %v2077_v21 = vpop.f32.mrf.mxu1  ;;  %2361 = vmatprep.subr.bf16.mxu1 %v2451_v13 }
  0xf7   :  { %v856_v20 = vadd.f32 %v1966_v15, %v3312_v29  ;;  %v2078_v23 = vadd.f32 %v2077_v21, %v2076_v16  ;;  %v221_v21 = vld [vmem:[%s3672_s0 + $0x640] sm:$0xff] }
  0xf8   :  { %v1968_v24 = vpop.f32.mrf.mxu0  ;;  %v2079_v27 = vpop.f32.mrf.mxu1 }
  0xf9   :  { %v1969_v26 = vadd.f32 %v1968_v24, %v1967_v18  ;;  %v3369_v28 = vadd.f32 %v2078_v23, %v856_v20  ;;  %2362 = vmatpush3.bf16.msra.mxu1 %v2451_v13 }
  0xfa   :  { %v1970_v30 = vpop.f32.mrf.mxu0  ;;  %1248 = vmatmul.mubr.bf16.gmra.mxu0 %v326_v19  ;;  %v2080_v32 = vpop.f32.mrf.mxu1 }
  0xfb   :  { %v859_v31 = vadd.f32 %v1969_v26, %v3312_v29  ;;  %1255 = vmatprep.mubr.bf16.mxu0 %v334_v22  ;;  %v2081_v35 = vadd.f32 %v2080_v32, %v2079_v27  ;;  %v228_v22 = vld [vmem:[%s3672_s0 + $0x678] sm:$0xff]  ;;  %v243_v26 = vld [vmem:[%s3672_s0 + $0x6f0] sm:$0xff] }
  0xfc   :  { %v1971_v36 = vpop.f32.mrf.mxu0  ;;  %v2082_v41 = vpop.f32.mrf.mxu1  ;;  %v347_v33 = vpack.c.bf16 %v228_v22, %v221_v21 }
  0xfd   :  { %v1972_v40 = vadd.f32 %v1971_v36, %v1970_v30  ;;  %v3387_v42 = vadd.f32 %v2081_v35, %v859_v31  ;;  %v355_v36 = vpack.c.bf16 %v243_v26, %v236_v25 }
  0xfe   :  { %v1973_v43 = vpop.f32.mrf.mxu0  ;;  %v2083_v47 = vpop.f32.mrf.mxu1 }
  0xff   :  { %v864_v46 = vadd.f32 %v1972_v40, %v3312_v29  ;;  %v2084_v49 = vadd.f32 %v2083_v47, %v2082_v41  ;;  %v235_v47 = vld [vmem:[%s3672_s0 + $0x6b0] sm:$0xff] }
 0x100   :  { %v1974_v50 = vpop.f32.mrf.mxu0  ;;  %v2085_v53 = vpop.f32.mrf.mxu1 }
 0x101   :  { %v1975_v52 = vadd.f32 %v1974_v50, %v1973_v43  ;;  %v3393_v54 = vadd.f32 %v2084_v49, %v864_v46 }
 0x102   :  { %v1976_v55 = vpop.f32.mrf.mxu0  ;;  %1256 = vmatmul.mubr.bf16.gmra.mxu0 %v333_v45  ;;  %v2086_v58 = vpop.f32.mrf.mxu1 }
 0x103   :  { %v867_v56 = vadd.f32 %v1975_v52, %v3312_v29  ;;  %1263 = vmatprep.mubr.bf16.mxu0 %v341_v48  ;;  %v2087_v61 = vadd.f32 %v2086_v58, %v2085_v53  ;;  %v242_v48 = vld [vmem:[%s3672_s0 + $0x6e8] sm:$0xff] }
 0x104   :  { %v1977_v62 = vpop.f32.mrf.mxu0  ;;  %v2088_v3 = vpop.f32.mrf.mxu1 }
 0x105   :  { %v1978_v2 = vadd.f32 %v1977_v62, %v1976_v55  ;;  %v3411_v5 = vadd.f32 %v2087_v61, %v867_v56  ;;  %v354_v56 = vpack.c.bf16 %v242_v48, %v235_v47 }
 0x106   :  { %v1979_v6 = vpop.f32.mrf.mxu0  ;;  %v2089_v9 = vpop.f32.mrf.mxu1 }
 0x107   :  { %v872_v8 = vadd.f32 %v1978_v2, %v3312_v29  ;;  %v2090_v11 = vadd.f32 %v2089_v9, %v2088_v3 }
 0x108   :  { %v1980_v12 = vpop.f32.mrf.mxu0  ;;  %v2091_v15 = vpop.f32.mrf.mxu1 }
 0x109   :  { %v1981_v14 = vadd.f32 %v1980_v12, %v1979_v6  ;;  %v3417_v16 = vadd.f32 %v2090_v11, %v872_v8 }
 0x10a   :  { %v1982_v18 = vpop.f32.mrf.mxu0  ;;  %1264 = vmatmul.mubr.bf16.gmra.mxu0 %v340_v7  ;;  %v2092_v20 = vpop.f32.mrf.mxu1 }
 0x10b   :  { %v875_v19 = vadd.f32 %v1981_v14, %v3312_v29  ;;  %1271 = vmatprep.mubr.bf16.mxu0 %v348_v10  ;;  %v2093_v23 = vadd.f32 %v2092_v20, %v2091_v15 }
 0x10c   :  { %v1983_v24 = vpop.f32.mrf.mxu0  ;;  %v2094_v30 = vpop.f32.mrf.mxu1 }
 0x10d   :  { %v1984_v27 = vadd.f32 %v1983_v24, %v1982_v18  ;;  %v3432_v31 = vadd.f32 %v2093_v23, %v875_v19 }
 0x10e   :  { %v1985_v32 = vpop.f32.mrf.mxu0  ;;  %v2095_v35 = vpop.f32.mrf.mxu1 }
 0x10f   :  { %v880_v34 = vadd.f32 %v1984_v27, %v3312_v29  ;;  %v2096_v37 = vadd.f32 %v2095_v35, %v2094_v30 }
 0x110   :  { %v1986_v38 = vpop.f32.mrf.mxu0  ;;  %v2097_v40 = vpop.f32.mrf.mxu1 }
 0x111   :  { %v1987_v39 = vadd.f32 %v1986_v38, %v1985_v32  ;;  %v3435_v41 = vadd.f32 %v2096_v37, %v880_v34 }
 0x112   :  { %v1988_v43 = vpop.f32.mrf.mxu0  ;;  %1272 = vmatmul.mubr.bf16.gmra.mxu0 %v347_v33  ;;  %v2098_v46 = vpop.f32.mrf.mxu1 }
 0x113   :  { %v883_v45 = vadd.f32 %v1987_v39, %v3312_v29  ;;  %1279 = vmatprep.mubr.bf16.mxu0 %v355_v36  ;;  %v2099_v49 = vadd.f32 %v2098_v46, %v2097_v40 }
 0x114   :  { %v1989_v50 = vpop.f32.mrf.mxu0  ;;  %v2100_v52 = vpop.f32.mrf.mxu1 }
 0x115   :  { %v1990_v51 = vadd.f32 %v1989_v50, %v1988_v43  ;;  %v3444_v53 = vadd.f32 %v2099_v49, %v883_v45 }
 0x116   :  { %v1991_v55 = vpop.f32.mrf.mxu0  ;;  %v2101_v59 = vpop.f32.mrf.mxu1 }
 0x117   :  { %v888_v58 = vadd.f32 %v1990_v51, %v3312_v29  ;;  %v2102_v60 = vadd.f32 %v2101_v59, %v2100_v52 }
 0x118   :  { %v1992_v61 = vpop.f32.mrf.mxu0  ;;  %v2103_v63 = vpop.f32.mrf.mxu1 }
 0x119   :  { %v1993_v62 = vadd.f32 %v1992_v61, %v1991_v55  ;;  %v3447_v0 = vadd.f32 %v2102_v60, %v888_v58 }
 0x11a   :  { %v1994_v1 = vpop.f32.mrf.mxu0  ;;  %1280 = vmatmul.mubr.bf16.gmra.mxu0 %v354_v56  ;;  %v2104_v3 = vpop.f32.mrf.mxu1 }
 0x11b   :  { %v891_v2 = vadd.f32 %v1993_v62, %v3312_v29  ;;  %v2105_v6 = vadd.f32 %v2104_v3, %v2103_v63 }
 0x11c   :  { %v1995_v7 = vpop.f32.mrf.mxu0  ;;  %v2106_v9 = vpop.f32.mrf.mxu1 }
 0x11d   :  { %v1996_v8 = vadd.f32 %v1995_v7, %v1994_v1  ;;  %v3450_v10 = vadd.f32 %v2105_v6, %v891_v2 }
 0x11e   :  { %v1997_v11 = vpop.f32.mrf.mxu0  ;;  %v2107_v13 = vpop.f32.mrf.mxu1 }
 0x11f   :  { %v896_v12 = vadd.f32 %v1996_v8, %v3312_v29  ;;  %v2108_v14 = vadd.f32 %v2107_v13, %v2106_v9 }
 0x120   :  { %v1998_v15 = vpop.f32.mrf.mxu0  ;;  %v2109_v19 = vpop.f32.mrf.mxu1 }
 0x121   :  { %v1999_v18 = vadd.f32 %v1998_v15, %v1997_v11  ;;  %v3453_v20 = vadd.f32 %v2108_v14, %v896_v12 }
 0x122   :  { %v2000_v21 = vpop.f32.mrf.mxu0  ;;  %v2110_v23 = vpop.f32.mrf.mxu1 }
 0x123   :  { %v899_v22 = vadd.f32 %v1999_v18, %v3312_v29  ;;  %v2111_v24 = vadd.f32 %v2110_v23, %v2109_v19 }
 0x124   :  { %v2001_v25 = vpop.f32.mrf.mxu0  ;;  %v2112_v27 = vpop.f32.mrf.mxu1 }
 0x125   :  { %v2002_v26 = vadd.f32 %v2001_v25, %v2000_v21  ;;  %v3456_v30 = vadd.f32 %v2111_v24, %v899_v22 }
 0x126   :  { %v2003_v32 = vpop.f32.mrf.mxu0  ;;  %v2113_v34 = vpop.f32.mrf.mxu1 }
 0x127   :  { %v904_v33 = vadd.f32 %v2002_v26, %v3312_v29  ;;  %v2114_v35 = vadd.f32 %v2113_v34, %v2112_v27 }
 0x128   :  { %v2004_v36 = vpop.f32.mrf.mxu0  ;;  %v2115_v38 = vpop.f32.mrf.mxu1 }
 0x129   :  { %v2005_v37 = vadd.f32 %v2004_v36, %v2003_v32  ;;  %v3459_v39 = vadd.f32 %v2114_v35, %v904_v33 }
 0x12a   :  { %v2006_v40 = vpop.f32.mrf.mxu0  ;;  %v2116_v45 = vpop.f32.mrf.mxu1 }
 0x12b   :  { %v907_v43 = vadd.f32 %v2005_v37, %v3312_v29  ;;  %v2117_v46 = vadd.f32 %v2116_v45, %v2115_v38 }
 0x12c   :  { %v2007_v47 = vpop.f32.mrf.mxu0  ;;  %v2118_v49 = vpop.f32.mrf.mxu1 }
 0x12d   :  { %v2008_v48 = vadd.f32 %v2007_v47, %v2006_v40  ;;  %v3462_v50 = vadd.f32 %v2117_v46, %v907_v43 }
 0x12e   :  { %v2009_v51 = vpop.f32.mrf.mxu0  ;;  %v2119_v55 = vpop.f32.mrf.mxu1 }
 0x12f   :  { %v912_v52 = vadd.f32 %v2008_v48, %v3312_v29  ;;  %v2120_v56 = vadd.f32 %v2119_v55, %v2118_v49 }
 0x130   :  { %v2010_v58 = vpop.f32.mrf.mxu0  ;;  %v2121_v60 = vpop.f32.mrf.mxu1 }
 0x131   :  { %v2011_v59 = vadd.f32 %v2010_v58, %v2009_v51  ;;  %v3465_v61 = vadd.f32 %v2120_v56, %v912_v52 }
 0x132   :  { %v2012_v62 = vpop.f32.mrf.mxu0  ;;  %v2122_v1 = vpop.f32.mrf.mxu1 }
 0x133   :  { %v915_v63 = vadd.f32 %v2011_v59, %v3312_v29  ;;  %v2123_v2 = vadd.f32 %v2122_v1, %v2121_v60 }
 0x134   :  { %v2013_v3 = vpop.f32.mrf.mxu0  ;;  %v2124_v7 = vpop.f32.mrf.mxu1 }
 0x135   :  { %v2014_v6 = vadd.f32 %v2013_v3, %v2012_v62  ;;  %v3468_v8 = vadd.f32 %v2123_v2, %v915_v63 }
 0x136   :  { %v2015_v9 = vpop.f32.mrf.mxu0  ;;  %v2125_v12 = vpop.f32.mrf.mxu1 }
 0x137   :  { %v920_v11 = vadd.f32 %v2014_v6, %v3312_v29  ;;  %v2126_v13 = vadd.f32 %v2125_v12, %v2124_v7 }
 0x138   :  { %v2016_v14 = vpop.f32.mrf.mxu0  ;;  %v2127_v18 = vpop.f32.mrf.mxu1 }
 0x139   :  { %v2017_v15 = vadd.f32 %v2016_v14, %v2015_v9  ;;  %v3471_v19 = vadd.f32 %v2126_v13, %v920_v11 }
 0x13a   :  { %v2018_v21 = vpop.f32.mrf.mxu0  ;;  %v2128_v23 = vpop.f32.mrf.mxu1 }
 0x13b   :  { %v923_v22 = vadd.f32 %v2017_v15, %v3312_v29  ;;  %v2129_v24 = vadd.f32 %v2128_v23, %v2127_v18 }
 0x13c   :  { %v2019_v25 = vpop.f32.mrf.mxu0  ;;  %v2130_v27 = vpop.f32.mrf.mxu1 }
 0x13d   :  { %v2020_v26 = vadd.f32 %v2019_v25, %v2018_v21  ;;  %v3474_v32 = vadd.f32 %v2129_v24, %v923_v22 }
 0x13e   :  { %v2021_v33 = vpop.f32.mrf.mxu0  ;;  %v2131_v35 = vpop.f32.mrf.mxu1 }
 0x13f   :  { %v928_v34 = vadd.f32 %v2020_v26, %v3312_v29  ;;  %v2132_v36 = vadd.f32 %v2131_v35, %v2130_v27 }
 0x140   :  { %v2022_v37 = vpop.f32.mrf.mxu0  ;;  %v2133_v40 = vpop.f32.mrf.mxu1 }
 0x141   :  { %v2023_v38 = vadd.f32 %v2022_v37, %v2021_v33  ;;  %v3477_v43 = vadd.f32 %v2132_v36, %v928_v34 }
 0x142   :  { %v2024_v45 = vpop.f32.mrf.mxu0  ;;  %v2134_v47 = vpop.f32.mrf.mxu1 }
 0x143   :  { %v931_v46 = vadd.f32 %v2023_v38, %v3312_v29  ;;  %v2135_v48 = vadd.f32 %v2134_v47, %v2133_v40 }
 0x144   :  { %v2025_v49 = vpop.f32.mrf.mxu0  ;;  %v2136_v52 = vpop.f32.mrf.mxu1 }
 0x145   :  { %v2026_v51 = vadd.f32 %v2025_v49, %v2024_v45  ;;  %v3480_v55 = vadd.f32 %v2135_v48, %v931_v46 }
 0x146   :  { %v2027_v56 = vpop.f32.mrf.mxu0  ;;  %v2137_v59 = vpop.f32.mrf.mxu1 }
 0x147   :  { %v936_v58 = vadd.f32 %v2026_v51, %v3312_v29  ;;  %v2138_v60 = vadd.f32 %v2137_v59, %v2136_v52 }
 0x148   :  { %v2028_v62 = vpop.f32.mrf.mxu0  ;;  %v2139_v1 = vpop.f32.mrf.mxu1 }
 0x149   :  { %v2029_v63 = vadd.f32 %v2028_v62, %v2027_v56  ;;  %v3483_v2 = vadd.f32 %v2138_v60, %v936_v58 }
 0x14a   :  { %v2030_v3 = vpop.f32.mrf.mxu0  ;;  %v2140_v7 = vpop.f32.mrf.mxu1 }
 0x14b   :  { %v939_v6 = vadd.f32 %v2029_v63, %v3312_v29  ;;  %v2141_v9 = vadd.f32 %v2140_v7, %v2139_v1 }
 0x14c   :  { %v2031_v11 = vpop.f32.mrf.mxu0  ;;  %v2142_v13 = vpop.f32.mrf.mxu1 }
 0x14d   :  { %v2032_v12 = vadd.f32 %v2031_v11, %v2030_v3  ;;  %v3486_v14 = vadd.f32 %v2141_v9, %v939_v6 }
 0x14e   :  { %v2033_v15 = vpop.f32.mrf.mxu0  ;;  %v2143_v21 = vpop.f32.mrf.mxu1 }
 0x14f   :  { %v944_v18 = vadd.f32 %v2032_v12, %v3312_v29  ;;  %v2144_v22 = vadd.f32 %v2143_v21, %v2142_v13 }
 0x150   :  { %v2034_v23 = vpop.f32.mrf.mxu0  ;;  %v2145_v25 = vpop.f32.mrf.mxu1 }
 0x151   :  { %v2035_v24 = vadd.f32 %v2034_v23, %v2033_v15  ;;  %v3489_v26 = vadd.f32 %v2144_v22, %v944_v18 }
 0x152   :  { %v2036_v27 = vpop.f32.mrf.mxu0  ;;  %v2146_v34 = vpop.f32.mrf.mxu1 }
 0x153   :  { %v947_v33 = vadd.f32 %v2035_v24, %v3312_v29  ;;  %v2147_v35 = vadd.f32 %v2146_v34, %v2145_v25 }
 0x154   :  { %v2037_v36 = vpop.f32.mrf.mxu0  ;;  %v2148_v38 = vpop.f32.mrf.mxu1 }
 0x155   :  { %v2038_v37 = vadd.f32 %v2037_v36, %v2036_v27  ;;  %v3492_v40 = vadd.f32 %v2147_v35, %v947_v33 }
 0x156   :  { %v2039_v45 = vpop.f32.mrf.mxu0  ;;  %v2149_v47 = vpop.f32.mrf.mxu1 }
 0x157   :  { %v952_v46 = vadd.f32 %v2038_v37, %v3312_v29  ;;  %v2150_v48 = vadd.f32 %v2149_v47, %v2148_v38 }
 0x158   :  { %v2040_v49 = vpop.f32.mrf.mxu0  ;;  %v2151_v52 = vpop.f32.mrf.mxu1 }
 0x159   :  { %v2041_v51 = vadd.f32 %v2040_v49, %v2039_v45  ;;  %v3495_v56 = vadd.f32 %v2150_v48, %v952_v46 }
 0x15a   :  { %v2042_v58 = vpop.f32.mrf.mxu0  ;;  %v2152_v60 = vpop.f32.mrf.mxu1 }
 0x15b   :  { %v955_v59 = vadd.f32 %v2041_v51, %v3312_v29  ;;  %v2153_v62 = vadd.f32 %v2152_v60, %v2151_v52 }
 0x15c   :  { %v2043_v63 = vpop.f32.mrf.mxu0  ;;  %v2154_v3 = vpop.f32.mrf.mxu1 }
 0x15d   :  { %v2044_v1 = vadd.f32 %v2043_v63, %v2042_v58  ;;  %v3498_v6 = vadd.f32 %v2153_v62, %v955_v59 }
 0x15e   :  { %v2045_v7 = vpop.f32.mrf.mxu0  ;;  %v2155_v11 = vpop.f32.mrf.mxu1 }
 0x15f   :  { %v960_v9 = vadd.f32 %v2044_v1, %v3312_v29  ;;  %v2156_v12 = vadd.f32 %v2155_v11, %v2154_v3 }
 0x160   :  { %v2046_v13 = vpop.f32.mrf.mxu0  ;;  %v2157_v18 = vpop.f32.mrf.mxu1 }
 0x161   :  { %v2047_v15 = vadd.f32 %v2046_v13, %v2045_v7  ;;  %v3501_v21 = vadd.f32 %v2156_v12, %v960_v9 }
 0x162   :  { %v2176_v22 = vpop.f32.mrf.mxu0  ;;  %v2158_v24 = vpop.f32.mrf.mxu1 }
 0x163   :  { %v963_v23 = vadd.f32 %v2047_v15, %v3312_v29  ;;  %v2159_v25 = vadd.f32 %v2158_v24, %v2157_v18 }
 0x164   :  { %v2177_v27 = vpop.f32.mrf.mxu0  ;;  %v2317_v34 = vpop.f32.mrf.mxu1 }
 0x165   :  { %v2178_v33 = vadd.f32 %v2177_v27, %v2176_v22  ;;  %v3504_v35 = vadd.f32 %v2159_v25, %v963_v23 }
 0x166   :  { %v2179_v36 = vpop.f32.mrf.mxu0  ;;  %v1322_v38 = vpop.f32.mrf.mxu1 }
 0x167   :  { %v1162_v37 = vadd.f32 %v2178_v33, %v3321_v44 }
 0x168   :  { %v2180_v45 = vpop.f32.mrf.mxu0  ;;  %v2318_v48 = vpop.f32.mrf.mxu1 }
 0x169   :  { %v2181_v46 = vadd.f32 %v2180_v45, %v2179_v36  ;;  %v1323_v47 = vadd.f32 %v1322_v38, %v1162_v37 }
 0x16a   :  { %v2182_v49 = vpop.f32.mrf.mxu0  ;;  %v1325_v29 = vpop.f32.mrf.mxu1 }
 0x16b   :  { %v1449_v51 = vmul.f32 0.5, %v1323_v47  ;;  %v1165_v52 = vadd.f32 %v2181_v46, %v3339_v57 }
 0x16c   :  { %v2183_v58 = vpop.f32.mrf.mxu0  ;;  %v2321_v63 = vpop.f32.mrf.mxu1 }
 0x16d   :  { %2452 = vtanh.f32 %v1449_v51  ;;  %v2184_v59 = vadd.f32 %v2183_v58, %v2182_v49  ;;  %v1326_v60 = vadd.f32 %v1325_v29, %v1165_v52 }
 0x16e   :  { %v2185_v62 = vpop.f32.mrf.mxu0  ;;  %v1338_v12 = vpop.f32.mrf.mxu1 }
 0x16f   :  { %v1170_v1 = vadd.f32 %v2184_v59, %v3345_v4  ;;  %v1450_v3 = vmul.f32 0.5, %v1326_v60 }
 0x170   :  { %v2186_v44 = vpop.f32.mrf.mxu0  ;;  %v2322_v24 = vpop.f32.mrf.mxu1 }
 0x171   :  { %v1331_v7 = vadd.f32 %v2317_v34, %v1170_v1  ;;  %2454 = vtanh.f32 %v1450_v3  ;;  %v2187_v9 = vadd.f32 %v2186_v44, %v2185_v62 }
 0x172   :  { %v2188_v11 = vpop.f32.mrf.mxu0  ;;  %v1341_v38 = vpop.f32.mrf.mxu1 }
 0x173   :  { %v1451_v13 = vmul.f32 0.5, %v1331_v7  ;;  %v1173_v15 = vadd.f32 %v2187_v9, %v3363_v17 }
 0x174   :  { %v2189_v57 = vpop.f32.mrf.mxu0  ;;  %v2325_v29 = vpop.f32.mrf.mxu1 }
 0x175   :  { %2456 = vtanh.f32 %v1451_v13  ;;  %v1334_v18 = vadd.f32 %v2318_v48, %v1173_v15  ;;  %v2190_v22 = vadd.f32 %v2189_v57, %v2188_v11 }
 0x176   :  { %v2191_v23 = vpop.f32.mrf.mxu0  ;;  %v1354_v9 = vpop.f32.mrf.mxu1 }
 0x177   :  { %v1452_v25 = vmul.f32 0.5, %v1334_v18  ;;  %v1178_v27 = vadd.f32 %v2190_v22, %v3369_v28 }
 0x178   :  { %v2192_v4 = vpop.f32.mrf.mxu0 }
 0x179   :  { %2458 = vtanh.f32 %v1452_v25  ;;  %v2193_v33 = vadd.f32 %v2192_v4, %v2191_v23  ;;  %v1339_v34 = vadd.f32 %v1338_v12, %v1178_v27  ;;  %v2326_v25 = vpop.f32.mrf.mxu1 }
 0x17a   :  { %v2453_v36 = vpop.eup %2452  ;;  %v2194_v37 = vpop.f32.mrf.mxu0 }
 0x17b   :  { %v1453_v45 = vmul.f32 0.5, %v1339_v34  ;;  %v1181_v46 = vadd.f32 %v2193_v33, %v3387_v42  ;;  %v1513_v17 = vmul.f32 0.5, %v2453_v36 }
 0x17c   :  { %v2195_v47 = vpop.f32.mrf.mxu0 }
 0x17d   :  { %2460 = vtanh.f32 %v1453_v45  ;;  %v2196_v48 = vadd.f32 %v2195_v47, %v2194_v37  ;;  %v1342_v49 = vadd.f32 %v1341_v38, %v1181_v46  ;;  %v1545_v60 = vadd.f32 0.5, %v1513_v17  ;;  %v1357_v46 = vpop.f32.mrf.mxu1 }
 0x17e   :  { %v2455_v51 = vpop.eup %2454  ;;  %v2197_v52 = vpop.f32.mrf.mxu0 }
 0x17f   :  { %v1514_v58 = vmul.f32 0.5, %v2455_v51  ;;  %v1186_v28 = vadd.f32 %v2196_v48, %v3393_v54  ;;  %v1454_v59 = vmul.f32 0.5, %v1342_v49 }
 0x180   :  { %v2198_v62 = vpop.f32.mrf.mxu0 }
 0x181   :  { %v1546_v1 = vadd.f32 0.5, %v1514_v58  ;;  %v1347_v3 = vadd.f32 %v2321_v63, %v1186_v28  ;;  %2462 = vtanh.f32 %v1454_v59  ;;  %v2199_v44 = vadd.f32 %v2198_v62, %v2197_v52  ;;  %v2329_v28 = vpop.f32.mrf.mxu1 }
 0x182   :  { %v2457_v7 = vpop.eup %2456  ;;  %v2200_v42 = vpop.f32.mrf.mxu0 }
 0x183   :  { %v1455_v11 = vmul.f32 0.5, %v1347_v3  ;;  %v1189_v12 = vadd.f32 %v2199_v44, %v3411_v5  ;;  %v1577_v13 = vpack.c.bf16 %v1546_v1, %v1545_v60  ;;  %v1515_v15 = vmul.f32 0.5, %v2457_v7 }
 0x184   :  { %v2201_v57 = vpop.f32.mrf.mxu0 }
 0x185   :  { %2464 = vtanh.f32 %v1455_v11  ;;  %v1350_v18 = vadd.f32 %v2322_v24, %v1189_v12  ;;  %v2202_v22 = vadd.f32 %v2201_v57, %v2200_v42  ;;  %2363 = vmatprep.mubr.bf16.mxu1 %v1577_v13  ;;  %v1547_v33 = vadd.f32 0.5, %v1515_v15  ;;  %v1370_v11 = vpop.f32.mrf.mxu1 }
 0x186   :  { %v2459_v54 = vpop.eup %2458  ;;  %v2203_v23 = vpop.f32.mrf.mxu0 }
 0x187   :  { %v1516_v27 = vmul.f32 0.5, %v2459_v54  ;;  %v1456_v63 = vmul.f32 0.5, %v1350_v18  ;;  %v1194_v4 = vadd.f32 %v2202_v22, %v3417_v16 }
 0x188   :  { %v2204_v34 = vpop.f32.mrf.mxu0 }
 0x189   :  { %v1548_v36 = vadd.f32 0.5, %v1516_v27  ;;  %2466 = vtanh.f32 %v1456_v63  ;;  %v2205_v37 = vadd.f32 %v2204_v34, %v2203_v23  ;;  %v1355_v5 = vadd.f32 %v1354_v9, %v1194_v4  ;;  %v2330_v27 = vpop.f32.mrf.mxu1 }
 0x18a   :  { %v2461_v38 = vpop.eup %2460  ;;  %v2206_v45 = vpop.f32.mrf.mxu0 }
 0x18b   :  { %v1578_v17 = vpack.c.bf16 %v1548_v36, %v1547_v33  ;;  %v1457_v24 = vmul.f32 0.5, %v1355_v5  ;;  %v1197_v47 = vadd.f32 %v2205_v37, %v3432_v31  ;;  %v1517_v48 = vmul.f32 0.5, %v2461_v38 }
 0x18c   :  { %v2207_v49 = vpop.f32.mrf.mxu0 }
 0x18d   :  { %2468 = vtanh.f32 %v1457_v24  ;;  %v2208_v51 = vadd.f32 %v2207_v49, %v2206_v45  ;;  %v1358_v52 = vadd.f32 %v1357_v46, %v1197_v47  ;;  %2364 = vmatmul.mubr.bf16.vlgmr.msra.gmra.mxu1 %v1578_v17  ;;  %v1549_v1 = vadd.f32 0.5, %v1517_v48  ;;  %v1373_v45 = vpop.f32.mrf.mxu1 }
 0x18e   :  { %v2463_v16 = vpop.eup %2462  ;;  %v2209_v58 = vpop.f32.mrf.mxu0 }
 0x18f   :  { %v1518_v59 = vmul.f32 0.5, %v2463_v16  ;;  %v1202_v60 = vadd.f32 %v2208_v51, %v3435_v41  ;;  %v1458_v62 = vmul.f32 0.5, %v1358_v52  ;;  %v2333_v52 = vpop.f32.mrf.mxu1 }
 0x190   :  { %v2210_v3 = vpop.f32.mrf.mxu0 }
 0x191   :  { %v1550_v44 = vadd.f32 0.5, %v1518_v59  ;;  %v1363_v7 = vadd.f32 %v2325_v29, %v1202_v60  ;;  %2470 = vtanh.f32 %v1458_v62  ;;  %v2211_v42 = vadd.f32 %v2210_v3, %v2209_v58 }
 0x192   :  { %v2465_v31 = vpop.eup %2464  ;;  %v2212_v9 = vpop.f32.mrf.mxu0 }
 0x193   :  { %v1459_v12 = vmul.f32 0.5, %v1363_v7  ;;  %v1205_v13 = vadd.f32 %v2211_v42, %v3444_v53  ;;  %v1579_v15 = vpack.c.bf16 %v1550_v44, %v1549_v1  ;;  %v1519_v18 = vmul.f32 0.5, %v2465_v31  ;;  %v1386_v42 = vpop.f32.mrf.mxu1 }
 0x194   :  { %v2213_v57 = vpop.f32.mrf.mxu0 }
 0x195   :  { %2472 = vtanh.f32 %v1459_v12  ;;  %v1366_v22 = vadd.f32 %v2326_v25, %v1205_v13  ;;  %v2214_v54 = vadd.f32 %v2213_v57, %v2212_v9  ;;  %2367 = vmatprep.mubr.bf16.mxu1 %v1579_v15  ;;  %v1551_v34 = vadd.f32 0.5, %v1519_v18 }
 0x196   :  { %v2467_v41 = vpop.eup %2466  ;;  %v2215_v23 = vpop.f32.mrf.mxu0 }
 0x197   :  { %v1460_v63 = vmul.f32 0.5, %v1366_v22  ;;  %v1210_v29 = vadd.f32 %v2214_v54, %v3447_v0  ;;  %v1520_v4 = vmul.f32 0.5, %v2467_v41  ;;  %v2334_v22 = vpop.f32.mrf.mxu1 }
 0x198   :  { %v2216_v33 = vpop.f32.mrf.mxu0 }
 0x199   :  { %2474 = vtanh.f32 %v1460_v63  ;;  %v2217_v36 = vadd.f32 %v2216_v33, %v2215_v23  ;;  %v1371_v37 = vadd.f32 %v1370_v11, %v1210_v29  ;;  %v1552_v53 = vadd.f32 0.5, %v1520_v4 }
 0x19a   :  { %v2469_v5 = vpop.eup %2468  ;;  %v2218_v38 = vpop.f32.mrf.mxu0 }
 0x19b   :  { %v1461_v46 = vmul.f32 0.5, %v1371_v37  ;;  %v1213_v25 = vadd.f32 %v2217_v36, %v3450_v10  ;;  %v1580_v17 = vpack.c.bf16 %v1552_v53, %v1551_v34  ;;  %v1521_v24 = vmul.f32 0.5, %v2469_v5  ;;  %v1389_v36 = vpop.f32.mrf.mxu1 }
 0x19c   :  { %v2219_v47 = vpop.f32.mrf.mxu0 }
 0x19d   :  { %2476 = vtanh.f32 %v1461_v46  ;;  %v2220_v48 = vadd.f32 %v2219_v47, %v2218_v38  ;;  %v1374_v49 = vadd.f32 %v1373_v45, %v1213_v25  ;;  %2368 = vmatmul.mubr.bf16.gmra.mxu1 %v1580_v17  ;;  %v1553_v60 = vadd.f32 0.5, %v1521_v24  ;;  %v2337_v17 = vpop.f32.mrf.mxu1 }
 0x19e   :  { %v2471_v0 = vpop.eup %2470  ;;  %v2221_v51 = vpop.f32.mrf.mxu0 }
 0x19f   :  { %v1522_v16 = vmul.f32 0.5, %v2471_v0  ;;  %v1218_v58 = vadd.f32 %v2220_v48, %v3453_v20  ;;  %v1462_v59 = vmul.f32 0.5, %v1374_v49 }
 0x1a0   :  { %v2222_v62 = vpop.f32.mrf.mxu0 }
 0x1a1   :  { %v1554_v1 = vadd.f32 0.5, %v1522_v16  ;;  %v1379_v3 = vadd.f32 %v2329_v28, %v1218_v58  ;;  %2478 = vtanh.f32 %v1462_v59  ;;  %v2223_v10 = vadd.f32 %v2222_v62, %v2221_v51 }
 0x1a2   :  { %v2473_v44 = vpop.eup %2472  ;;  %v2224_v7 = vpop.f32.mrf.mxu0 }
 0x1a3   :  { %v1463_v31 = vmul.f32 0.5, %v1379_v3  ;;  %v1221_v9 = vadd.f32 %v2223_v10, %v3456_v30  ;;  %v1581_v11 = vpack.c.bf16 %v1554_v1, %v1553_v60  ;;  %v1523_v13 = vmul.f32 0.5, %v2473_v44  ;;  %v1402_v60 = vpop.f32.mrf.mxu1 }
 0x1a4   :  { %v2225_v12 = vpop.f32.mrf.mxu0 }
 0x1a5   :  { %2480 = vtanh.f32 %v1463_v31  ;;  %v1382_v15 = vadd.f32 %v2330_v27, %v1221_v9  ;;  %v2226_v57 = vadd.f32 %v2225_v12, %v2224_v7  ;;  %2371 = vmatprep.mubr.bf16.mxu1 %v1581_v11  ;;  %v1555_v63 = vadd.f32 0.5, %v1523_v13  ;;  %v2338_v9 = vpop.f32.mrf.mxu1 }
 0x1a6   :  { %v2475_v20 = vpop.eup %2474  ;;  %v2227_v18 = vpop.f32.mrf.mxu0 }
 0x1a7   :  { %v1464_v54 = vmul.f32 0.5, %v1382_v15  ;;  %v1226_v28 = vadd.f32 %v2226_v57, %v3459_v39  ;;  %v1524_v41 = vmul.f32 0.5, %v2475_v20 }
 0x1a8   :  { %v2228_v23 = vpop.f32.mrf.mxu0 }
 0x1a9   :  { %2482 = vtanh.f32 %v1464_v54  ;;  %v2229_v29 = vadd.f32 %v2228_v23, %v2227_v18  ;;  %v1387_v4 = vadd.f32 %v1386_v42, %v1226_v28  ;;  %v1556_v30 = vadd.f32 0.5, %v1524_v41  ;;  %v1405_v28 = vpop.f32.mrf.mxu1 }
 0x1aa   :  { %v2477_v33 = vpop.eup %2476  ;;  %v2230_v34 = vpop.f32.mrf.mxu0 }
 0x1ab   :  { %v1465_v37 = vmul.f32 0.5, %v1387_v4  ;;  %v1229_v27 = vadd.f32 %v2229_v29, %v3462_v50  ;;  %v1582_v53 = vpack.c.bf16 %v1556_v30, %v1555_v63  ;;  %v1525_v5 = vmul.f32 0.5, %v2477_v33 }
 0x1ac   :  { %v2231_v38 = vpop.f32.mrf.mxu0 }
 0x1ad   :  { %2484 = vtanh.f32 %v1465_v37  ;;  %v2232_v45 = vadd.f32 %v2231_v38, %v2230_v34  ;;  %v1390_v46 = vadd.f32 %v1389_v36, %v1229_v27  ;;  %2372 = vmatmul.mubr.bf16.gmra.mxu1 %v1582_v53  ;;  %v1557_v49 = vadd.f32 0.5, %v1525_v5  ;;  %v2341_v34 = vpop.f32.mrf.mxu1 }
 0x1ae   :  { %v2479_v39 = vpop.eup %2478  ;;  %v2233_v25 = vpop.f32.mrf.mxu0 }
 0x1af   :  { %v1526_v24 = vmul.f32 0.5, %v2479_v39  ;;  %v1234_v47 = vadd.f32 %v2232_v45, %v3465_v61  ;;  %v1466_v48 = vmul.f32 0.5, %v1390_v46 }
 0x1b0   :  { %v2234_v0 = vpop.f32.mrf.mxu0 }
 0x1b1   :  { %v1558_v51 = vadd.f32 0.5, %v1526_v24  ;;  %v1395_v16 = vadd.f32 %v2333_v52, %v1234_v47  ;;  %2486 = vtanh.f32 %v1466_v48  ;;  %v2235_v50 = vadd.f32 %v2234_v0, %v2233_v25  ;;  %v1418_v25 = vpop.f32.mrf.mxu1 }
 0x1b2   :  { %v2481_v58 = vpop.eup %2480  ;;  %v2236_v59 = vpop.f32.mrf.mxu0 }
 0x1b3   :  { %v1467_v62 = vmul.f32 0.5, %v1395_v16  ;;  %v1237_v1 = vadd.f32 %v2235_v50, %v3468_v8  ;;  %v1583_v3 = vpack.c.bf16 %v1558_v51, %v1557_v49  ;;  %v1527_v44 = vmul.f32 0.5, %v2481_v58  ;;  %v2342_v58 = vpop.f32.mrf.mxu1 }
 0x1b4   :  { %v2237_v10 = vpop.f32.mrf.mxu0 }
 0x1b5   :  { %2488 = vtanh.f32 %v1467_v62  ;;  %v1398_v7 = vadd.f32 %v2334_v22, %v1237_v1  ;;  %v2238_v42 = vadd.f32 %v2237_v10, %v2236_v59  ;;  %2375 = vmatprep.mubr.bf16.mxu1 %v1583_v3  ;;  %v1559_v15 = vadd.f32 0.5, %v1527_v44 }
 0x1b6   :  { %v2483_v61 = vpop.eup %2482  ;;  %v2239_v31 = vpop.f32.mrf.mxu0 }
 0x1b7   :  { %v1468_v11 = vmul.f32 0.5, %v1398_v7  ;;  %v1242_v52 = vadd.f32 %v2238_v42, %v3471_v19  ;;  %v1528_v12 = vmul.f32 0.5, %v2483_v61  ;;  %v1421_v42 = vpop.f32.mrf.mxu1 }
 0x1b8   :  { %v2240_v13 = vpop.f32.mrf.mxu0 }
 0x1b9   :  { %2490 = vtanh.f32 %v1468_v11  ;;  %v2241_v57 = vadd.f32 %v2240_v13, %v2239_v31  ;;  %v1403_v20 = vadd.f32 %v1402_v60, %v1242_v52  ;;  %v1560_v8 = vadd.f32 0.5, %v1528_v12 }
 0x1ba   :  { %v2485_v18 = vpop.eup %2484  ;;  %v2242_v54 = vpop.f32.mrf.mxu0 }
 0x1bb   :  { %v1469_v41 = vmul.f32 0.5, %v1403_v20  ;;  %v1245_v22 = vadd.f32 %v2241_v57, %v3474_v32  ;;  %v1584_v23 = vpack.c.bf16 %v1560_v8, %v1559_v15  ;;  %v1529_v63 = vmul.f32 0.5, %v2485_v18  ;;  %v2345_v57 = vpop.f32.mrf.mxu1 }
 0x1bc   :  { %v2243_v29 = vpop.f32.mrf.mxu0 }
 0x1bd   :  { %2492 = vtanh.f32 %v1469_v41  ;;  %v2244_v4 = vadd.f32 %v2243_v29, %v2242_v54  ;;  %v1406_v30 = vadd.f32 %v1405_v28, %v1245_v22  ;;  %2376 = vmatmul.mubr.bf16.gmra.mxu1 %v1584_v23  ;;  %v1561_v53 = vadd.f32 0.5, %v1529_v63  ;;  %v1434_v29 = vpop.f32.mrf.mxu1 }
 0x1be   :  { %v2487_v19 = vpop.eup %2486  ;;  %v2245_v33 = vpop.f32.mrf.mxu0 }
 0x1bf   :  { %v1530_v36 = vmul.f32 0.5, %v2487_v19  ;;  %v1250_v37 = vadd.f32 %v2244_v4, %v3477_v43  ;;  %v1470_v27 = vmul.f32 0.5, %v1406_v30 }
 0x1c0   :  { %v2246_v5 = vpop.f32.mrf.mxu0 }
 0x1c1   :  { %v1562_v38 = vadd.f32 0.5, %v1530_v36  ;;  %v1411_v45 = vadd.f32 %v2337_v17, %v1250_v37  ;;  %2494 = vtanh.f32 %v1470_v27  ;;  %v2247_v32 = vadd.f32 %v2246_v5, %v2245_v33  ;;  %v2346_v5 = vpop.f32.mrf.mxu1 }
 0x1c2   :  { %v2489_v46 = vpop.eup %2488  ;;  %v2248_v39 = vpop.f32.mrf.mxu0 }
 0x1c3   :  { %v1471_v24 = vmul.f32 0.5, %v1411_v45  ;;  %v1253_v47 = vadd.f32 %v2247_v32, %v3480_v55  ;;  %v1585_v48 = vpack.c.bf16 %v1562_v38, %v1561_v53  ;;  %v1531_v49 = vmul.f32 0.5, %v2489_v46 }
 0x1c4   :  { %v2249_v0 = vpop.f32.mrf.mxu0 }
 0x1c5   :  { %2496 = vtanh.f32 %v1471_v24  ;;  %v1414_v51 = vadd.f32 %v2338_v9, %v1253_v47  ;;  %v2250_v16 = vadd.f32 %v2249_v0, %v2248_v39  ;;  %2379 = vmatprep.mubr.bf16.mxu1 %v1585_v48  ;;  %v1563_v1 = vadd.f32 0.5, %v1531_v49  ;;  %v1437_v48 = vpop.f32.mrf.mxu1 }
 0x1c6   :  { %v2491_v43 = vpop.eup %2490  ;;  %v2251_v50 = vpop.f32.mrf.mxu0 }
 0x1c7   :  { %v1532_v59 = vmul.f32 0.5, %v2491_v43  ;;  %v1472_v17 = vmul.f32 0.5, %v1414_v51  ;;  %v1258_v60 = vadd.f32 %v2250_v16, %v3483_v2 }
 0x1c8   :  { %v2252_v62 = vpop.f32.mrf.mxu0 }
 0x1c9   :  { %2498 = vtanh.f32 %v1472_v17  ;;  %v2253_v3 = vadd.f32 %v2252_v62, %v2251_v50  ;;  %v1419_v10 = vadd.f32 %v1418_v25, %v1258_v60  ;;  %v1564_v55 = vadd.f32 0.5, %v1532_v59 }
 0x1ca   :  { %v2493_v44 = vpop.eup %2492  ;;  %v2254_v7 = vpop.f32.mrf.mxu0 }
 0x1cb   :  { %v1473_v61 = vmul.f32 0.5, %v1419_v10  ;;  %v1261_v31 = vadd.f32 %v2253_v3, %v3486_v14  ;;  %v1586_v9 = vpack.c.bf16 %v1564_v55, %v1563_v1  ;;  %v1533_v11 = vmul.f32 0.5, %v2493_v44 }
 0x1cc   :  { %v2255_v52 = vpop.f32.mrf.mxu0 }
 0x1cd   :  { %2500 = vtanh.f32 %v1473_v61  ;;  %v2256_v12 = vadd.f32 %v2255_v52, %v2254_v7  ;;  %v1422_v13 = vadd.f32 %v1421_v42, %v1261_v31  ;;  %2380 = vmatmul.mubr.bf16.gmra.mxu1 %v1586_v9  ;;  %v1565_v54 = vadd.f32 0.5, %v1533_v11 }
 0x1ce   :  { %v2495_v2 = vpop.eup %2494  ;;  %v2257_v15 = vpop.f32.mrf.mxu0 }
 0x1cf   :  { %v1534_v20 = vmul.f32 0.5, %v2495_v2  ;;  %v1266_v8 = vadd.f32 %v2256_v12, %v3489_v26  ;;  %v1474_v18 = vmul.f32 0.5, %v1422_v13 }
 0x1d0   :  { %v2258_v28 = vpop.f32.mrf.mxu0 }
 0x1d1   :  { %v1566_v41 = vadd.f32 0.5, %v1534_v20  ;;  %v1427_v22 = vadd.f32 %v2341_v34, %v1266_v8  ;;  %2502 = vtanh.f32 %v1474_v18  ;;  %v2259_v14 = vadd.f32 %v2258_v28, %v2257_v15 }
 0x1d2   :  { %v2497_v23 = vpop.eup %2496  ;;  %v2260_v63 = vpop.f32.mrf.mxu0 }
 0x1d3   :  { %v1475_v4 = vmul.f32 0.5, %v1427_v22  ;;  %v1269_v30 = vadd.f32 %v2259_v14, %v3492_v40  ;;  %v1587_v19 = vpack.c.bf16 %v1566_v41, %v1565_v54  ;;  %v1535_v33 = vmul.f32 0.5, %v2497_v23 }
 0x1d4   :  { %v2261_v36 = vpop.f32.mrf.mxu0 }
 0x1d5   :  { %2504 = vtanh.f32 %v1475_v4  ;;  %v1430_v37 = vadd.f32 %v2342_v58, %v1269_v30  ;;  %v2262_v27 = vadd.f32 %v2261_v36, %v2260_v63  ;;  %2383 = vmatprep.mubr.bf16.mxu1 %v1587_v19  ;;  %v1567_v46 = vadd.f32 0.5, %v1535_v33  ;;  %v3541_v4 = vld [vmem:[%s3675_s4] ss:$0 sm:$0xff] }
 0x1d6   :  { %v2499_v26 = vpop.eup %2498  ;;  %v2263_v53 = vpop.f32.mrf.mxu0 }
 0x1d7   :  { %v1536_v38 = vmul.f32 0.5, %v2499_v26  ;;  %v1476_v34 = vmul.f32 0.5, %v1430_v37  ;;  %v1274_v45 = vadd.f32 %v2262_v27, %v3495_v56 }
 0x1d8   :  { %v2264_v32 = vpop.f32.mrf.mxu0 }
 0x1d9   :  { %2506 = vtanh.f32 %v1476_v34  ;;  %v2265_v39 = vadd.f32 %v2264_v32, %v2263_v53  ;;  %v1435_v25 = vadd.f32 %v1434_v29, %v1274_v45  ;;  %v1568_v40 = vadd.f32 0.5, %v1536_v38 }
 0x1da   :  { %v2501_v24 = vpop.eup %2500  ;;  %v2266_v47 = vpop.f32.mrf.mxu0 }
 0x1db   :  { %v1477_v49 = vmul.f32 0.5, %v1435_v25  ;;  %v1277_v0 = vadd.f32 %v2265_v39, %v3498_v6  ;;  %v1588_v51 = vpack.c.bf16 %v1568_v40, %v1567_v46  ;;  %v1537_v16 = vmul.f32 0.5, %v2501_v24 }
 0x1dc   :  { %v2267_v43 = vpop.f32.mrf.mxu0 }
 0x1dd   :  { %2508 = vtanh.f32 %v1477_v49  ;;  %v2268_v50 = vadd.f32 %v2267_v43, %v2266_v47  ;;  %v1438_v58 = vadd.f32 %v1437_v48, %v1277_v0  ;;  %2384 = vmatmul.mubr.bf16.gmra.mxu1 %v1588_v51  ;;  %v1569_v1 = vadd.f32 0.5, %v1537_v16 }
 0x1de   :  { %v2503_v56 = vpop.eup %2502  ;;  %v2269_v59 = vpop.f32.mrf.mxu0 }
 0x1df   :  { %v1538_v17 = vmul.f32 0.5, %v2503_v56  ;;  %v1282_v60 = vadd.f32 %v2268_v50, %v3501_v21  ;;  %v1478_v62 = vmul.f32 0.5, %v1438_v58 }
 0x1e0   :  { %v2270_v3 = vpop.f32.mrf.mxu0 }
 0x1e1   :  { %v1570_v10 = vadd.f32 0.5, %v1538_v17  ;;  %v1443_v55 = vadd.f32 %v2345_v57, %v1282_v60  ;;  %2510 = vtanh.f32 %v1478_v62  ;;  %v2271_v44 = vadd.f32 %v2270_v3, %v2269_v59 }
 0x1e2   :  { %v2505_v6 = vpop.eup %2504 }
 0x1e3   :  { %v1479_v7 = vmul.f32 0.5, %v1443_v55  ;;  %v1285_v42 = vadd.f32 %v2271_v44, %v3504_v35  ;;  %v1589_v61 = vpack.c.bf16 %v1570_v10, %v1569_v1  ;;  %v1539_v31 = vmul.f32 0.5, %v2505_v6 }
 0x1e5   :  { %2512 = vtanh.f32 %v1479_v7  ;;  %v1446_v9 = vadd.f32 %v2346_v5, %v1285_v42  ;;  %2387 = vmatprep.mubr.bf16.mxu1 %v1589_v61  ;;  %v1571_v21 = vadd.f32 0.5, %v1539_v31 }
 0x1e6   :  { %v2507_v11 = vpop.eup %2506 }
 0x1e7   :  { %v1540_v52 = vmul.f32 0.5, %v2507_v11  ;;  %v1480_v12 = vmul.f32 0.5, %v1446_v9 }
 0x1e9   :  { %2514 = vtanh.f32 %v1480_v12  ;;  %v1572_v13 = vadd.f32 0.5, %v1540_v52 }
 0x1ea   :  { %v2509_v2 = vpop.eup %2508 }
 0x1eb   :  { %v1590_v15 = vpack.c.bf16 %v1572_v13, %v1571_v21  ;;  %v1541_v57 = vmul.f32 0.5, %v2509_v2 }
 0x1ed   :  { %2388 = vmatmul.mubr.bf16.gmra.mxu1 %v1590_v15  ;;  %v1573_v18 = vadd.f32 0.5, %v1541_v57 }
 0x1ee   :  { %v2511_v20 = vpop.eup %2510 }
 0x1ef   :  { %v1542_v8 = vmul.f32 0.5, %v2511_v20 }
 0x1f1   :  { %v1574_v54 = vadd.f32 0.5, %v1542_v8 }
 0x1f2   :  { %v2513_v35 = vpop.eup %2512 }
 0x1f3   :  { %v1591_v28 = vpack.c.bf16 %v1574_v54, %v1573_v18  ;;  %v1543_v41 = vmul.f32 0.5, %v2513_v35 }
 0x1f5   :  { %2391 = vmatprep.mubr.bf16.mxu1 %v1591_v28  ;;  %v1575_v23 = vadd.f32 0.5, %v1543_v41 }
 0x1f6   :  { %v2515_v22 = vpop.eup %2514 }
 0x1f7   :  { %v1544_v14 = vmul.f32 0.5, %v2515_v22 }
 0x1f9   :  { %v1576_v63 = vadd.f32 0.5, %v1544_v14 }
 0x1fb   :  { %v1592_v29 = vpack.c.bf16 %v1576_v63, %v1575_v23 }
 0x1fd   :  { %2392 = vmatmul.mubr.bf16.gmra.mxu1 %v1592_v29 }
 0x24d   :  { %v2365_v30 = vpop.f32.mrf.mxu1 }
 0x24e   :  { %v1707_v19 = vadd.f32 %v2365_v30, %v3541_v4 }
 0x24f   :  { %v1698_v33 = vpop.f32.mrf.mxu1 }
 0x250   :  { %1827 = vst [vmem:[%s3676_s5 + $0x10] sm:$0xff] %v1707_v19  ;;  %v1699_v36 = vadd.f32 %v3541_v4, %v1698_v33 }
 0x251   :  { %v2366_v37 = vpop.f32.mrf.mxu1 }
 0x252   :  { %1825 = vst [vmem:[%s3676_s5] sm:$0xff] %v1699_v36  ;;  %v1710_v27 = vadd.f32 %v2366_v37, %v3541_v4 }
 0x253   :  { %v1701_v26 = vpop.f32.mrf.mxu1 }
 0x254   :  { %1828 = vst [vmem:[%s3676_s5 + $0x18] sm:$0xff] %v1710_v27  ;;  %v1702_v53 = vadd.f32 %v3541_v4, %v1701_v26 }
 0x256   :  { %1826 = vst [vmem:[%s3676_s5 + $0x8] sm:$0xff] %v1702_v53 }
 0x25d   :  { %v2369_v5 = vpop.f32.mrf.mxu1 }
 0x25e   :  { %v1723_v38 = vadd.f32 %v2369_v5, %v3541_v4 }
 0x25f   :  { %v1714_v34 = vpop.f32.mrf.mxu1 }
 0x260   :  { %1831 = vst [vmem:[%s3676_s5 + $0x30] sm:$0xff] %v1723_v38  ;;  %v1715_v45 = vadd.f32 %v3541_v4, %v1714_v34 }
 0x261   :  { %v2370_v32 = vpop.f32.mrf.mxu1 }
 0x262   :  { %1829 = vst [vmem:[%s3676_s5 + $0x20] sm:$0xff] %v1715_v45  ;;  %v1726_v46 = vadd.f32 %v2370_v32, %v3541_v4 }
 0x263   :  { %v1717_v39 = vpop.f32.mrf.mxu1 }
 0x264   :  { %1832 = vst [vmem:[%s3676_s5 + $0x38] sm:$0xff] %v1726_v46  ;;  %v1718_v25 = vadd.f32 %v3541_v4, %v1717_v39 }
 0x266   :  { %1830 = vst [vmem:[%s3676_s5 + $0x28] sm:$0xff] %v1718_v25 }
 0x26d   :  { %v2373_v40 = vpop.f32.mrf.mxu1 }
 0x26e   :  { %v1739_v24 = vadd.f32 %v2373_v40, %v3541_v4 }
 0x26f   :  { %v1730_v47 = vpop.f32.mrf.mxu1 }
 0x270   :  { %1835 = vst [vmem:[%s3676_s5 + $0x50] sm:$0xff] %v1739_v24  ;;  %v1731_v48 = vadd.f32 %v3541_v4, %v1730_v47 }
 0x271   :  { %v2374_v49 = vpop.f32.mrf.mxu1 }
 0x272   :  { %1833 = vst [vmem:[%s3676_s5 + $0x40] sm:$0xff] %v1731_v48  ;;  %v1742_v0 = vadd.f32 %v2374_v49, %v3541_v4 }
 0x273   :  { %v1733_v51 = vpop.f32.mrf.mxu1 }
 0x274   :  { %1836 = vst [vmem:[%s3676_s5 + $0x58] sm:$0xff] %v1742_v0  ;;  %v1734_v16 = vadd.f32 %v3541_v4, %v1733_v51 }
 0x276   :  { %1834 = vst [vmem:[%s3676_s5 + $0x48] sm:$0xff] %v1734_v16 }
 0x27d   :  { %v2377_v43 = vpop.f32.mrf.mxu1 }
 0x27e   :  { %v1755_v50 = vadd.f32 %v2377_v43, %v3541_v4 }
 0x27f   :  { %v1746_v58 = vpop.f32.mrf.mxu1 }
 0x280   :  { %1839 = vst [vmem:[%s3676_s5 + $0x70] sm:$0xff] %v1755_v50  ;;  %v1747_v56 = vadd.f32 %v3541_v4, %v1746_v58 }
 0x281   :  { %v2378_v59 = vpop.f32.mrf.mxu1 }
 0x282   :  { %1837 = vst [vmem:[%s3676_s5 + $0x60] sm:$0xff] %v1747_v56  ;;  %v1758_v17 = vadd.f32 %v2378_v59, %v3541_v4 }
 0x283   :  { %v1749_v60 = vpop.f32.mrf.mxu1 }
 0x284   :  { %1840 = vst [vmem:[%s3676_s5 + $0x78] sm:$0xff] %v1758_v17  ;;  %v1750_v62 = vadd.f32 %v3541_v4, %v1749_v60 }
 0x286   :  { %1838 = vst [vmem:[%s3676_s5 + $0x68] sm:$0xff] %v1750_v62 }
 0x28d   :  { %v2381_v1 = vpop.f32.mrf.mxu1 }
 0x28e   :  { %v1771_v3 = vadd.f32 %v2381_v1, %v3541_v4 }
 0x28f   :  { %v1762_v10 = vpop.f32.mrf.mxu1 }
 0x290   :  { %1843 = vst [vmem:[%s3676_s5 + $0x90] sm:$0xff] %v1771_v3  ;;  %v1763_v55 = vadd.f32 %v3541_v4, %v1762_v10 }
 0x291   :  { %v2382_v44 = vpop.f32.mrf.mxu1 }
 0x292   :  { %1841 = vst [vmem:[%s3676_s5 + $0x80] sm:$0xff] %v1763_v55  ;;  %v1774_v6 = vadd.f32 %v2382_v44, %v3541_v4 }
 0x293   :  { %v1765_v7 = vpop.f32.mrf.mxu1 }
 0x294   :  { %1844 = vst [vmem:[%s3676_s5 + $0x98] sm:$0xff] %v1774_v6  ;;  %v1766_v42 = vadd.f32 %v3541_v4, %v1765_v7 }
 0x296   :  { %1842 = vst [vmem:[%s3676_s5 + $0x88] sm:$0xff] %v1766_v42 }
 0x29d   :  { %v2385_v61 = vpop.f32.mrf.mxu1 }
 0x29e   :  { %v1787_v31 = vadd.f32 %v2385_v61, %v3541_v4 }
 0x29f   :  { %v1778_v9 = vpop.f32.mrf.mxu1 }
 0x2a0   :  { %1847 = vst [vmem:[%s3676_s5 + $0xb0] sm:$0xff] %v1787_v31  ;;  %v1779_v11 = vadd.f32 %v3541_v4, %v1778_v9 }
 0x2a1   :  { %v2386_v52 = vpop.f32.mrf.mxu1 }
 0x2a2   :  { %1845 = vst [vmem:[%s3676_s5 + $0xa0] sm:$0xff] %v1779_v11  ;;  %v1790_v12 = vadd.f32 %v2386_v52, %v3541_v4 }
 0x2a3   :  { %v1781_v21 = vpop.f32.mrf.mxu1 }
 0x2a4   :  { %1848 = vst [vmem:[%s3676_s5 + $0xb8] sm:$0xff] %v1790_v12  ;;  %v1782_v13 = vadd.f32 %v3541_v4, %v1781_v21 }
 0x2a6   :  { %1846 = vst [vmem:[%s3676_s5 + $0xa8] sm:$0xff] %v1782_v13 }
 0x2ad   :  { %v2389_v2 = vpop.f32.mrf.mxu1 }
 0x2ae   :  { %v1803_v15 = vadd.f32 %v2389_v2, %v3541_v4 }
 0x2af   :  { %v1794_v57 = vpop.f32.mrf.mxu1 }
 0x2b0   :  { %1851 = vst [vmem:[%s3676_s5 + $0xd0] sm:$0xff] %v1803_v15  ;;  %v1795_v20 = vadd.f32 %v3541_v4, %v1794_v57 }
 0x2b1   :  { %v2390_v8 = vpop.f32.mrf.mxu1 }
 0x2b2   :  { %1849 = vst [vmem:[%s3676_s5 + $0xc0] sm:$0xff] %v1795_v20  ;;  %v1806_v18 = vadd.f32 %v2390_v8, %v3541_v4 }
 0x2b3   :  { %v1797_v54 = vpop.f32.mrf.mxu1 }
 0x2b4   :  { %1852 = vst [vmem:[%s3676_s5 + $0xd8] sm:$0xff] %v1806_v18  ;;  %v1798_v35 = vadd.f32 %v3541_v4, %v1797_v54 }
 0x2b6   :  { %1850 = vst [vmem:[%s3676_s5 + $0xc8] sm:$0xff] %v1798_v35 }
 0x2bd   :  { %v2393_v28 = vpop.f32.mrf.mxu1 }
 0x2be   :  { %v1819_v41 = vadd.f32 %v2393_v28, %v3541_v4 }
 0x2bf   :  { %v1810_v22 = vpop.f32.mrf.mxu1 }
 0x2c0   :  { %1855 = vst [vmem:[%s3676_s5 + $0xf0] sm:$0xff] %v1819_v41  ;;  %v1811_v14 = vadd.f32 %v3541_v4, %v1810_v22 }
 0x2c1   :  { %v2394_v23 = vpop.f32.mrf.mxu1 }
 0x2c2   :  { %1853 = vst [vmem:[%s3676_s5 + $0xe0] sm:$0xff] %v1811_v14  ;;  %v1822_v63 = vadd.f32 %v2394_v23, %v3541_v4 }
 0x2c3   :  { %v1813_v29 = vpop.f32.mrf.mxu1 }
 0x2c4   :  { %1856 = vst [vmem:[%s3676_s5 + $0xf8] sm:$0xff] %v1822_v63  ;;  %v1814_v30 = vadd.f32 %v3541_v4, %v1813_v29 }
 0x2c6   :  { %1854 = vst [vmem:[%s3676_s5 + $0xe8] sm:$0xff] %v1814_v30 }

</bundles_post_ra>
